<compile_context>
chip_gen: v5e
topology: v5e:2x2
jax: 0.10.0
libtpu: 0.0.40
codegen_flags: <defaults>
</compile_context>

<pallas_src>
import functools
import math

import jax
import jax.numpy as jnp
from jax import lax
from jax.experimental import pallas as pl
from jax.experimental.pallas import tpu as pltpu


def _bi_attention_kernel(x_ref, m_ref, mask_ref,
                         wi1_ref, wm1_ref, wi2_ref, bi2_ref, wm2_ref, bm2_ref,
                         out1_ref, mem2_ref,
                         mem_cdt_ref, m2_cdt_ref, colb_ref,
                         gmax_ref, zsum_ref, oacc_ref,
                         *, inv_scale, hid, ld_tile, n_ld, split_store,
                         matmul_dtype):
    f32 = jnp.float32
    cdt = matmul_dtype
    i = pl.program_id(1)          # Ld-tile index (inner, "arbitrary")

    # ---------------- per-batch-element init (first Ld tile) ----------------
    @pl.when(i == 0)
    def _init():
        mem = m_ref[0]                                                  # (Lm, d_mem) f32
        mem_cdt_ref[...] = mem.astype(cdt)                              # cast once, reuse
        # memory_linear_1 (out=1, no bias): VPU lane reduction, not a 1-wide matmul.
        memory_dot = jnp.sum(mem * wm1_ref[...], axis=-1, keepdims=True)  # (Lm, 1)
        # Fuse memory_dot^T with the additive mask bias into one (1, Lm) row.
        colb_ref[...] = memory_dot.T + 1e30 * (mask_ref[0] - 1.0)
        # memory_linear_2 (bias=True): MXU, f32 accumulate; cache bf16 copy for o1.
        m2 = jnp.dot(mem_cdt_ref[...], wm2_ref[...],
                     preferred_element_type=f32) + bm2_ref[...]         # (Lm, hid)
        mem2_ref[0] = m2.astype(mem2_ref.dtype)
        m2_cdt_ref[...] = m2.astype(cdt)
        # running stats for softmax over Ld (weight_two / output_two)
        gmax_ref[...] = jnp.full(gmax_ref.shape, -jnp.inf, dtype=f32)
        zsum_ref[...] = jnp.zeros(zsum_ref.shape, dtype=f32)
        oacc_ref[...] = jnp.zeros(oacc_ref.shape, dtype=f32)

    # ---------------- per-Ld-tile work ---------------------------------------
    x = x_ref[0]                                                        # (ld_tile, d_in)
    # input_linear_1 (out=1, no bias): VPU lane reduction.
    input_dot = jnp.sum(x * wi1_ref[...], axis=-1, keepdims=True)       # (ld_tile, 1)

    # cross = (x / sqrt(d_in)) @ mem^T  (transposed-RHS contraction, no mem.T temp)
    x_c = (x * inv_scale).astype(cdt)
    cross = lax.dot_general(x_c, mem_cdt_ref[...],
                            dimension_numbers=(((1,), (1,)), ((), ())),
                            preferred_element_type=f32)                 # (ld_tile, Lm)

    # input_dot is constant per row -> cancels in the softmax over Lm, so it is
    # NOT broadcast over (ld_tile, Lm); it only shifts the row max for weight_two.
    att = cross + colb_ref[...]                                         # (ld_tile, Lm)
    row_max = jnp.max(att, axis=-1, keepdims=True)                      # (ld_tile, 1)

    p = jnp.exp(att - row_max)                                          # (ld_tile, Lm)
    sum_p = jnp.sum(p, axis=-1, keepdims=True)                          # (ld_tile, 1)
    # weight_one @ memory2 with late normalization (scale the hid-wide result).
    o1 = jnp.dot(p.astype(cdt), m2_cdt_ref[...],
                 preferred_element_type=f32) * pl.reciprocal(sum_p, approx=True)

    # input_linear_2 (bias=True)
    x2 = jnp.dot(x.astype(cdt), wi2_ref[...],
                 preferred_element_type=f32) + bi2_ref[...]             # (ld_tile, hid)

    # flash-style running softmax over Ld for weight_two / output_two
    rm2 = row_max + input_dot                                           # (ld_tile, 1)
    m_old = gmax_ref[...]                                               # (1, 1)
    m_new = jnp.maximum(m_old, jnp.max(rm2, axis=0, keepdims=True))     # (1, 1)
    alpha = jnp.exp(m_old - m_new)
    e2 = jnp.exp(rm2 - m_new)                                           # (ld_tile, 1)
    zsum_ref[...] = alpha * zsum_ref[...] + jnp.sum(e2, axis=0, keepdims=True)
    oacc_ref[...] = alpha * oacc_ref[...] + jnp.sum(e2 * x2, axis=0, keepdims=True)
    gmax_ref[...] = m_new

    # ---------------- store chunks 0..2 for this tile -------------------------
    odt = out1_ref.dtype
    if n_ld == 1:
        rows = slice(None)
    else:
        rows = pl.ds(pl.multiple_of(i * ld_tile, ld_tile), ld_tile)
    if split_store:   # hid % 128 == 0: lane-aligned unmasked stores, no concat temp
        out1_ref[0, rows, 0 * hid:1 * hid] = x2.astype(odt)
        out1_ref[0, rows, 1 * hid:2 * hid] = o1.astype(odt)
        out1_ref[0, rows, 2 * hid:3 * hid] = (x2 * o1).astype(odt)
    else:
        out1_ref[0, rows, 0:3 * hid] = jnp.concatenate(
            [x2, o1, x2 * o1], axis=-1).astype(odt)

    # ---------------- finalize output_two * output_one on the last tile -------
    @pl.when(i == n_ld - 1)
    def _fin():
        o2 = oacc_ref[...] * pl.reciprocal(zsum_ref[...], approx=True)  # (1, hid)
        # out1 block is resident across the Ld axis: read o1 back from VMEM.
        o1_all = out1_ref[0, :, 1 * hid:2 * hid].astype(f32)            # (Ld, hid)
        out1_ref[0, :, 3 * hid:4 * hid] = (o2 * o1_all).astype(odt)


def bi_attention(inp, memory, mask, params, *, matmul_dtype=jnp.bfloat16,
                 out_dtype=jnp.float32, ld_block=None):
    """inp: (N, Ld, d_in), memory: (N, Lm, d_mem), mask: (N, Lm) float.
    Returns (concat_output (N, Ld, 4*hid), memory2 (N, Lm, hid))."""
    N, Ld, d_in = inp.shape
    _, Lm, d_mem = memory.shape
    hid = params["wi2"].shape[1]
    inv_scale = 1.0 / math.sqrt(d_in)

    # Ld tile choice: must divide Ld and be a sublane multiple; otherwise 1 tile.
    if (ld_block is None or ld_block >= Ld or Ld % ld_block != 0
            or ld_block % 8 != 0):
        ld_t = Ld
    else:
        ld_t = ld_block
    n_ld = Ld // ld_t

    mask3 = mask.reshape(N, 1, Lm).astype(jnp.float32)

    # Weight preprocessing (once, outside the kernel).
    wi1_row = params["wi1"].reshape(1, d_in).astype(jnp.float32)
    wm1_row = params["wm1"].reshape(1, d_mem).astype(jnp.float32)
    wi2 = params["wi2"].astype(matmul_dtype)
    wm2 = params["wm2"].astype(matmul_dtype)
    bi2 = params["bi2"].reshape(1, hid).astype(jnp.float32)
    bm2 = params["bm2"].reshape(1, hid).astype(jnp.float32)

    kernel = functools.partial(
        _bi_attention_kernel, inv_scale=inv_scale, hid=hid,
        ld_tile=ld_t, n_ld=n_ld, split_store=(hid % 128 == 0),
        matmul_dtype=matmul_dtype)

    # Size the scoped-VMEM limit from the actual per-step working set (+headroom):
    # double-buffered ins/outs, single-buffered weights, scratch, f32 temps.
    cb = jnp.dtype(matmul_dtype).itemsize
    ob = jnp.dtype(out_dtype).itemsize
    est = (2 * ld_t * d_in * 4 + 2 * Lm * d_mem * 4 + 2 * Lm * 4          # x, mem, mask
           + (d_in + d_mem) * hid * cb + (d_in + d_mem + 2 * hid) * 4     # weights/bias
           + 2 * Ld * 4 * hid * ob + 2 * Lm * hid * 4                     # out1, mem2
           + Lm * (d_mem + hid) * cb + Lm * 4 + hid * 4 + 64              # scratch
           + 4 * ld_t * Lm * 4 + 6 * ld_t * hid * 4)                      # live temps
    vmem_limit = min(max(int(est * 1.3), 32 * 1024 * 1024), 128 * 1024 * 1024)

    out_shapes = (jax.ShapeDtypeStruct((N, Ld, 4 * hid), out_dtype),
                  jax.ShapeDtypeStruct((N, Lm, hid), jnp.float32))

    def _call(weight_mode):
        def wspec(shape):
            index_map = lambda b, i, _s=shape: (0,) * len(_s)
            if weight_mode is None:
                return pl.BlockSpec(shape, index_map)
            return pl.BlockSpec(shape, index_map, pipeline_mode=weight_mode)

        grid_spec = pltpu.PrefetchScalarGridSpec(
            num_scalar_prefetch=0,
            grid=(N, n_ld),
            in_specs=[
                pl.BlockSpec((1, ld_t, d_in), lambda b, i: (b, i, 0)),   # input
                pl.BlockSpec((1, Lm, d_mem), lambda b, i: (b, 0, 0)),    # memory
                pl.BlockSpec((1, 1, Lm), lambda b, i: (b, 0, 0)),        # mask
                wspec((1, d_in)),                                        # wi1 (row)
                wspec((1, d_mem)),                                       # wm1 (row)
                wspec((d_in, hid)),                                      # wi2
                wspec((1, hid)),                                         # bi2
                wspec((d_mem, hid)),                                     # wm2
                wspec((1, hid)),                                         # bm2
            ],
            out_specs=[
                # Resident per batch element across the Ld axis (accumulator-style).
                pl.BlockSpec((1, Ld, 4 * hid), lambda b, i: (b, 0, 0)),
                pl.BlockSpec((1, Lm, hid), lambda b, i: (b, 0, 0)),
            ],
            scratch_shapes=[
                pltpu.VMEM((Lm, d_mem), matmul_dtype),   # memory cast once
                pltpu.VMEM((Lm, hid), matmul_dtype),     # memory2 cached for o1 matmul
                pltpu.VMEM((1, Lm), jnp.float32),        # memory_dot^T + mask bias
                pltpu.VMEM((1, 1), jnp.float32),         # running max  (weight_two)
                pltpu.VMEM((1, 1), jnp.float32),         # running sum  (weight_two)
                pltpu.VMEM((1, hid), jnp.float32),       # running o2 accumulator
            ])

        return pl.pallas_call(
            kernel,
            out_shape=out_shapes,
            grid_spec=grid_spec,
            compiler_params=pltpu.CompilerParams(
                dimension_semantics=("parallel", "arbitrary"),
                vmem_limit_bytes=vmem_limit),
        )(inp, memory, mask3, wi1_row, wm1_row, wi2, bi2, wm2, bm2)

    try:
        # Constant index maps -> fetched once; request single buffering to halve
        # the weight VMEM reservation.
        return _call(pl.Buffered(1))
    except Exception:
        # Fallback for JAX versions that reject Buffered(1) on the main pipeline.
        return _call(None)


def _reference(inp, memory, mask, params):
    d_in = inp.shape[-1]
    dot_scale = math.sqrt(d_in)
    input_dot = inp @ params["wi1"]                                   # (N, Ld, 1)
    memory_dot = jnp.swapaxes(memory @ params["wm1"], 1, 2)           # (N, 1, Lm)
    cross = jnp.einsum("nid,njd->nij", inp, memory) / dot_scale
    att = input_dot + memory_dot + cross
    att = att - 1e30 * (1.0 - mask[:, None, :])
    x2 = inp @ params["wi2"] + params["bi2"]
    m2 = memory @ params["wm2"] + params["bm2"]
    w1 = jax.nn.softmax(att, axis=-1)
    o1 = jnp.einsum("nij,njh->nih", w1, m2)
    w2 = jax.nn.softmax(jnp.max(att, axis=-1), axis=-1)[:, None, :]   # (N, 1, Ld)
    o2 = jnp.einsum("nij,njh->nih", w2, x2)                           # (N, 1, hid)
    out = jnp.concatenate([x2, o1, x2 * o1, o2 * o1], axis=-1)
    return out, m2


if __name__ == "__main__":
    key = jax.random.PRNGKey(0)
    N, Ld, Lm = 2, 16, 8
    d_in, d_mem, hid = 32, 32, 32

    ks = jax.random.split(key, 10)
    inp = jax.random.normal(ks[0], (N, Ld, d_in), jnp.float32)
    memory = jax.random.normal(ks[1], (N, Lm, d_mem), jnp.float32)
    mask = (jax.random.uniform(ks[2], (N, Lm)) > 0.2).astype(jnp.float32)

    def uni(k, shape, fan_in):
        b = 1.0 / math.sqrt(fan_in)
        return jax.random.uniform(k, shape, jnp.float32, -b, b)

    # Weights stored pre-transposed (in_features, out_features) for y = x @ W.
    params = {
        "wi1": uni(ks[3], (d_in, 1), d_in),
        "wm1": uni(ks[4], (d_mem, 1), d_mem),
        "wi2": uni(ks[5], (d_in, hid), d_in),
        "bi2": uni(ks[6], (1, hid), d_in),
        "wm2": uni(ks[7], (d_mem, hid), d_mem),
        "bm2": uni(ks[8], (1, hid), d_mem),
    }

    ref1, ref2 = _reference(inp, memory, mask, params)

    # f32 MXU path, single Ld tile (tight check; approx reciprocal sets the tol).
    out1_f, mem2_f = bi_attention(inp, memory, mask, params,
                                  matmul_dtype=jnp.float32)
    jax.block_until_ready((out1_f, mem2_f))
    assert out1_f.shape == (N, Ld, 4 * hid) and mem2_f.shape == (N, Lm, hid)
    assert jnp.allclose(out1_f, ref1, atol=1e-2, rtol=1e-2)
    assert jnp.allclose(mem2_f, ref2, atol=1e-2, rtol=1e-2)

    # default bf16-MXU path, single Ld tile (softmax/mask math stays f32).
    out1, mem2 = bi_attention(inp, memory, mask, params)
    jax.block_until_ready((out1, mem2))
    assert out1.shape == (N, Ld, 4 * hid) and mem2.shape == (N, Lm, hid)
    assert jnp.allclose(out1, ref1, atol=1e-1, rtol=5e-2)
    assert jnp.allclose(mem2, ref2, atol=1e-1, rtol=5e-2)

    # bf16-MXU path with the flash-style Ld tiling exercised (2 tiles of 8 rows).
    out1_t, mem2_t = bi_attention(inp, memory, mask, params, ld_block=8)
    jax.block_until_ready((out1_t, mem2_t))
    assert jnp.allclose(out1_t, ref1, atol=1e-1, rtol=5e-2)
    assert jnp.allclose(mem2_t, ref2, atol=1e-1, rtol=5e-2)

    print("KERNEL_OK")
</pallas_src>

<mosaic_0001>
module attributes {stable_mosaic.version = 11 : i64} {
  func.func @_bi_attention_kernel(%arg0: i32, %arg1: i32, %arg2: memref<1x16x32xf32, #tpu.memory_space<vmem>>, %arg3: memref<1x8x32xf32, #tpu.memory_space<vmem>>, %arg4: memref<1x1x8xf32, #tpu.memory_space<vmem>>, %arg5: memref<1x32xf32, #tpu.memory_space<vmem>>, %arg6: memref<1x32xf32, #tpu.memory_space<vmem>>, %arg7: memref<32x32xf32, #tpu.memory_space<vmem>>, %arg8: memref<1x32xf32, #tpu.memory_space<vmem>>, %arg9: memref<32x32xf32, #tpu.memory_space<vmem>>, %arg10: memref<1x32xf32, #tpu.memory_space<vmem>>, %arg11: memref<1x16x128xf32, #tpu.memory_space<vmem>>, %arg12: memref<1x8x32xf32, #tpu.memory_space<vmem>>, %arg13: memref<8x32xf32, #tpu.memory_space<vmem>>, %arg14: memref<8x32xf32, #tpu.memory_space<vmem>>, %arg15: memref<1x8xf32, #tpu.memory_space<vmem>>, %arg16: memref<1x1xf32, #tpu.memory_space<vmem>>, %arg17: memref<1x1xf32, #tpu.memory_space<vmem>>, %arg18: memref<1x32xf32, #tpu.memory_space<vmem>>) attributes {dimension_semantics = [#tpu.dimension_semantics<parallel>, #tpu.dimension_semantics<arbitrary>], iteration_bounds = array<i64: 2, 1>, scalar_prefetch = 0 : i64, scratch_operands = 6 : i64, tpu.core_type = #tpu.core_type<tc>, window_params = [{transform_indices = @transform_0, window_bounds = array<i64: 1, 16, 32>}, {transform_indices = @transform_1, window_bounds = array<i64: 1, 8, 32>}, {transform_indices = @transform_2, window_bounds = array<i64: 1, 1, 8>}, {pipeline_mode = #tpu.pipeline_mode<synchronous>, transform_indices = @transform_3, window_bounds = array<i64: 1, 32>}, {pipeline_mode = #tpu.pipeline_mode<synchronous>, transform_indices = @transform_4, window_bounds = array<i64: 1, 32>}, {pipeline_mode = #tpu.pipeline_mode<synchronous>, transform_indices = @transform_5, window_bounds = array<i64: 32, 32>}, {pipeline_mode = #tpu.pipeline_mode<synchronous>, transform_indices = @transform_6, window_bounds = array<i64: 1, 32>}, {pipeline_mode = #tpu.pipeline_mode<synchronous>, transform_indices = @transform_7, window_bounds = array<i64: 32, 32>}, {pipeline_mode = #tpu.pipeline_mode<synchronous>, transform_indices = @transform_8, window_bounds = array<i64: 1, 32>}, {transform_indices = @transform_9, window_bounds = array<i64: 1, 16, 128>}, {transform_indices = @transform_10, window_bounds = array<i64: 1, 8, 32>}]} {
    %c0_i32 = arith.constant 0 : i32
    %0 = arith.cmpi eq, %arg1, %c0_i32 : i32
    %1 = arith.extui %0 : i1 to i32
    %c0_i32_0 = arith.constant 0 : i32
    %2 = arith.cmpi ne, %1, %c0_i32_0 : i32
    scf.if %2 {
      %c0_41 = arith.constant 0 : index
      %c0_42 = arith.constant 0 : index
      %c0_43 = arith.constant 0 : index
      %68 = vector.load %arg3[%c0_41, %c0_42, %c0_43] : memref<1x8x32xf32, #tpu.memory_space<vmem>>, vector<1x8x32xf32>
      %69 = vector.shape_cast %68 : vector<1x8x32xf32> to vector<8x32xf32>
      %c0_44 = arith.constant 0 : index
      %c0_45 = arith.constant 0 : index
      %70 = vector.load %arg13[%c0_44, %c0_45] : memref<8x32xf32, #tpu.memory_space<vmem>>, vector<8x32xf32>
      tpu.vector_store %arg13[%c0_44, %c0_45], %69 {strides = array<i32>} : memref<8x32xf32, #tpu.memory_space<vmem>>, vector<8x32xf32>,
      %c0_46 = arith.constant 0 : index
      %c0_47 = arith.constant 0 : index
      %71 = vector.load %arg6[%c0_46, %c0_47] : memref<1x32xf32, #tpu.memory_space<vmem>>, vector<1x32xf32>
      %72 = vector.broadcast %71 : vector<1x32xf32> to vector<8x32xf32>
      %73 = arith.mulf %69, %72 : vector<8x32xf32>
      %cst_48 = arith.constant dense<0.000000e+00> : vector<8xf32>
      %74 = vector.multi_reduction <add>, %73, %cst_48 [1] : vector<8x32xf32> to vector<8xf32>
      %75 = vector.shape_cast %74 : vector<8xf32> to vector<8x1xf32>
      %76 = tpu.transpose %75, [1, 0] : vector<8x1xf32> -> vector<1x8xf32>
      %c0_49 = arith.constant 0 : index
      %c0_50 = arith.constant 0 : index
      %c0_51 = arith.constant 0 : index
      %77 = vector.load %arg4[%c0_49, %c0_50, %c0_51] : memref<1x1x8xf32, #tpu.memory_space<vmem>>, vector<1x1x8xf32>
      %78 = vector.shape_cast %77 : vector<1x1x8xf32> to vector<1x8xf32>
      %cst_52 = arith.constant 1.000000e+00 : f32
      %79 = vector.broadcast %cst_52 : f32 to vector<1x8xf32>
      %80 = arith.subf %78, %79 : vector<1x8xf32>
      %cst_53 = arith.constant 1.000000e+30 : f32
      %81 = vector.broadcast %cst_53 : f32 to vector<1x8xf32>
      %82 = arith.mulf %81, %80 : vector<1x8xf32>
      %83 = arith.addf %76, %82 : vector<1x8xf32>
      %c0_54 = arith.constant 0 : index
      %c0_55 = arith.constant 0 : index
      %84 = vector.load %arg15[%c0_54, %c0_55] : memref<1x8xf32, #tpu.memory_space<vmem>>, vector<1x8xf32>
      tpu.vector_store %arg15[%c0_54, %c0_55], %83 {strides = array<i32>} : memref<1x8xf32, #tpu.memory_space<vmem>>, vector<1x8xf32>,
      %c0_56 = arith.constant 0 : index
      %c0_57 = arith.constant 0 : index
      %85 = vector.load %arg13[%c0_56, %c0_57] : memref<8x32xf32, #tpu.memory_space<vmem>>, vector<8x32xf32>
      %c0_58 = arith.constant 0 : index
      %c0_59 = arith.constant 0 : index
      %86 = vector.load %arg9[%c0_58, %c0_59] : memref<32x32xf32, #tpu.memory_space<vmem>>, vector<32x32xf32>
      %cst_60 = arith.constant dense<0.000000e+00> : vector<8x32xf32>
      %87 = tpu.matmul %85, %86, %cst_60 {dimension_numbers = #tpu.dot_dimension_numbers<[1], [0], [0], [1], [0, 0, 1, 1], [], []>} : vector<8x32xf32>, vector<32x32xf32>, vector<8x32xf32> -> vector<8x32xf32>
      %c0_61 = arith.constant 0 : index
      %c0_62 = arith.constant 0 : index
      %88 = vector.load %arg10[%c0_61, %c0_62] : memref<1x32xf32, #tpu.memory_space<vmem>>, vector<1x32xf32>
      %89 = vector.broadcast %88 : vector<1x32xf32> to vector<8x32xf32>
      %90 = arith.addf %87, %89 : vector<8x32xf32>
      %c0_63 = arith.constant 0 : index
      %c0_64 = arith.constant 0 : index
      %c0_65 = arith.constant 0 : index
      %91 = vector.load %arg12[%c0_63, %c0_64, %c0_65] : memref<1x8x32xf32, #tpu.memory_space<vmem>>, vector<1x8x32xf32>
      %92 = vector.shape_cast %91 : vector<1x8x32xf32> to vector<8x32xf32>
      %93 = vector.shape_cast %90 : vector<8x32xf32> to vector<1x8x32xf32>
      tpu.vector_store %arg12[%c0_63, %c0_64, %c0_65], %93 {strides = array<i32>} : memref<1x8x32xf32, #tpu.memory_space<vmem>>, vector<1x8x32xf32>,
      %c0_66 = arith.constant 0 : index
      %c0_67 = arith.constant 0 : index
      %94 = vector.load %arg14[%c0_66, %c0_67] : memref<8x32xf32, #tpu.memory_space<vmem>>, vector<8x32xf32>
      tpu.vector_store %arg14[%c0_66, %c0_67], %90 {strides = array<i32>} : memref<8x32xf32, #tpu.memory_space<vmem>>, vector<8x32xf32>,
      %cst_68 = arith.constant 0xFF800000 : f32
      %95 = vector.broadcast %cst_68 : f32 to vector<1x1xf32>
      %c0_69 = arith.constant 0 : index
      %c0_70 = arith.constant 0 : index
      %96 = vector.load %arg16[%c0_69, %c0_70] : memref<1x1xf32, #tpu.memory_space<vmem>>, vector<1x1xf32>
      tpu.vector_store %arg16[%c0_69, %c0_70], %95 {strides = array<i32>} : memref<1x1xf32, #tpu.memory_space<vmem>>, vector<1x1xf32>,
      %cst_71 = arith.constant 0.000000e+00 : f32
      %97 = vector.broadcast %cst_71 : f32 to vector<1x1xf32>
      %c0_72 = arith.constant 0 : index
      %c0_73 = arith.constant 0 : index
      %98 = vector.load %arg17[%c0_72, %c0_73] : memref<1x1xf32, #tpu.memory_space<vmem>>, vector<1x1xf32>
      tpu.vector_store %arg17[%c0_72, %c0_73], %97 {strides = array<i32>} : memref<1x1xf32, #tpu.memory_space<vmem>>, vector<1x1xf32>,
      %cst_74 = arith.constant 0.000000e+00 : f32
      %99 = vector.broadcast %cst_74 : f32 to vector<1x32xf32>
      %c0_75 = arith.constant 0 : index
      %c0_76 = arith.constant 0 : index
      %100 = vector.load %arg18[%c0_75, %c0_76] : memref<1x32xf32, #tpu.memory_space<vmem>>, vector<1x32xf32>
      tpu.vector_store %arg18[%c0_75, %c0_76], %99 {strides = array<i32>} : memref<1x32xf32, #tpu.memory_space<vmem>>, vector<1x32xf32>,
    } else {
    }
    %c0 = arith.constant 0 : index
    %c0_1 = arith.constant 0 : index
    %c0_2 = arith.constant 0 : index
    %3 = vector.load %arg2[%c0, %c0_1, %c0_2] : memref<1x16x32xf32, #tpu.memory_space<vmem>>, vector<1x16x32xf32>
    %4 = vector.shape_cast %3 : vector<1x16x32xf32> to vector<16x32xf32>
    %c0_3 = arith.constant 0 : index
    %c0_4 = arith.constant 0 : index
    %5 = vector.load %arg5[%c0_3, %c0_4] : memref<1x32xf32, #tpu.memory_space<vmem>>, vector<1x32xf32>
    %6 = vector.broadcast %5 : vector<1x32xf32> to vector<16x32xf32>
    %7 = arith.mulf %4, %6 : vector<16x32xf32>
    %cst = arith.constant dense<0.000000e+00> : vector<16xf32>
    %8 = vector.multi_reduction <add>, %7, %cst [1] : vector<16x32xf32> to vector<16xf32>
    %9 = vector.shape_cast %8 : vector<16xf32> to vector<16x1xf32>
    %cst_5 = arith.constant 0.176776692 : f32
    %10 = vector.broadcast %cst_5 : f32 to vector<16x32xf32>
    %11 = arith.mulf %4, %10 : vector<16x32xf32>
    %c0_6 = arith.constant 0 : index
    %c0_7 = arith.constant 0 : index
    %12 = vector.load %arg13[%c0_6, %c0_7] : memref<8x32xf32, #tpu.memory_space<vmem>>, vector<8x32xf32>
    %cst_8 = arith.constant dense<0.000000e+00> : vector<16x8xf32>
    %13 = tpu.matmul %11, %12, %cst_8 {dimension_numbers = #tpu.dot_dimension_numbers<[1], [1], [0], [0], [0, 0, 1, 0], [], []>} : vector<16x32xf32>, vector<8x32xf32>, vector<16x8xf32> -> vector<16x8xf32>
    %c0_9 = arith.constant 0 : index
    %c0_10 = arith.constant 0 : index
    %14 = vector.load %arg15[%c0_9, %c0_10] : memref<1x8xf32, #tpu.memory_space<vmem>>, vector<1x8xf32>
    %15 = vector.broadcast %14 : vector<1x8xf32> to vector<16x8xf32>
    %16 = arith.addf %13, %15 : vector<16x8xf32>
    %cst_11 = arith.constant dense<0xFF800000> : vector<16xf32>
    %17 = vector.multi_reduction <maximumf>, %16, %cst_11 [1] : vector<16x8xf32> to vector<16xf32>
    %18 = vector.shape_cast %17 : vector<16xf32> to vector<16x1xf32>
    %19 = vector.broadcast %18 : vector<16x1xf32> to vector<16x8xf32>
    %20 = arith.subf %16, %19 : vector<16x8xf32>
    %21 = math.exp %20 : vector<16x8xf32>
    %cst_12 = arith.constant dense<0.000000e+00> : vector<16xf32>
    %22 = vector.multi_reduction <add>, %21, %cst_12 [1] : vector<16x8xf32> to vector<16xf32>
    %23 = vector.shape_cast %22 : vector<16xf32> to vector<16x1xf32>
    %c0_13 = arith.constant 0 : index
    %c0_14 = arith.constant 0 : index
    %24 = vector.load %arg14[%c0_13, %c0_14] : memref<8x32xf32, #tpu.memory_space<vmem>>, vector<8x32xf32>
    %cst_15 = arith.constant dense<0.000000e+00> : vector<16x32xf32>
    %25 = tpu.matmul %21, %24, %cst_15 {dimension_numbers = #tpu.dot_dimension_numbers<[1], [0], [0], [1], [0, 0, 1, 1], [], []>} : vector<16x8xf32>, vector<8x32xf32>, vector<16x32xf32> -> vector<16x32xf32>
    %26 = tpu.reciprocal %23 {approx = true} : vector<16x1xf32> -> vector<16x1xf32>
    %27 = vector.broadcast %26 : vector<16x1xf32> to vector<16x32xf32>
    %28 = arith.mulf %25, %27 : vector<16x32xf32>
    %c0_16 = arith.constant 0 : index
    %c0_17 = arith.constant 0 : index
    %29 = vector.load %arg7[%c0_16, %c0_17] : memref<32x32xf32, #tpu.memory_space<vmem>>, vector<32x32xf32>
    %cst_18 = arith.constant dense<0.000000e+00> : vector<16x32xf32>
    %30 = tpu.matmul %4, %29, %cst_18 {dimension_numbers = #tpu.dot_dimension_numbers<[1], [0], [0], [1], [0, 0, 1, 1], [], []>} : vector<16x32xf32>, vector<32x32xf32>, vector<16x32xf32> -> vector<16x32xf32>
    %c0_19 = arith.constant 0 : index
    %c0_20 = arith.constant 0 : index
    %31 = vector.load %arg8[%c0_19, %c0_20] : memref<1x32xf32, #tpu.memory_space<vmem>>, vector<1x32xf32>
    %32 = vector.broadcast %31 : vector<1x32xf32> to vector<16x32xf32>
    %33 = arith.addf %30, %32 : vector<16x32xf32>
    %34 = arith.addf %18, %9 : vector<16x1xf32>
    %c0_21 = arith.constant 0 : index
    %c0_22 = arith.constant 0 : index
    %35 = vector.load %arg16[%c0_21, %c0_22] : memref<1x1xf32, #tpu.memory_space<vmem>>, vector<1x1xf32>
    %cst_23 = arith.constant dense<0xFF800000> : vector<1xf32>
    %36 = vector.multi_reduction <maximumf>, %34, %cst_23 [0] : vector<16x1xf32> to vector<1xf32>
    %37 = vector.shape_cast %36 : vector<1xf32> to vector<1x1xf32>
    %38 = arith.maximumf %35, %37 : vector<1x1xf32>
    %39 = arith.subf %35, %38 : vector<1x1xf32>
    %40 = math.exp %39 : vector<1x1xf32>
    %41 = vector.broadcast %38 : vector<1x1xf32> to vector<16x1xf32>
    %42 = arith.subf %34, %41 : vector<16x1xf32>
    %43 = math.exp %42 : vector<16x1xf32>
    %c0_24 = arith.constant 0 : index
    %c0_25 = arith.constant 0 : index
    %44 = vector.load %arg17[%c0_24, %c0_25] : memref<1x1xf32, #tpu.memory_space<vmem>>, vector<1x1xf32>
    %45 = arith.mulf %40, %44 : vector<1x1xf32>
    %cst_26 = arith.constant dense<0.000000e+00> : vector<1xf32>
    %46 = vector.multi_reduction <add>, %43, %cst_26 [0] : vector<16x1xf32> to vector<1xf32>
    %47 = vector.shape_cast %46 : vector<1xf32> to vector<1x1xf32>
    %48 = arith.addf %45, %47 : vector<1x1xf32>
    %c0_27 = arith.constant 0 : index
    %c0_28 = arith.constant 0 : index
    %49 = vector.load %arg17[%c0_27, %c0_28] : memref<1x1xf32, #tpu.memory_space<vmem>>, vector<1x1xf32>
    tpu.vector_store %arg17[%c0_27, %c0_28], %48 {strides = array<i32>} : memref<1x1xf32, #tpu.memory_space<vmem>>, vector<1x1xf32>,
    %c0_29 = arith.constant 0 : index
    %c0_30 = arith.constant 0 : index
    %50 = vector.load %arg18[%c0_29, %c0_30] : memref<1x32xf32, #tpu.memory_space<vmem>>, vector<1x32xf32>
    %51 = vector.broadcast %40 : vector<1x1xf32> to vector<1x32xf32>
    %52 = arith.mulf %51, %50 : vector<1x32xf32>
    %53 = vector.broadcast %43 : vector<16x1xf32> to vector<16x32xf32>
    %54 = arith.mulf %53, %33 : vector<16x32xf32>
    %cst_31 = arith.constant dense<0.000000e+00> : vector<32xf32>
    %55 = vector.multi_reduction <add>, %54, %cst_31 [0] : vector<16x32xf32> to vector<32xf32>
    %56 = vector.shape_cast %55 : vector<32xf32> to vector<1x32xf32>
    %57 = arith.addf %52, %56 : vector<1x32xf32>
    %c0_32 = arith.constant 0 : index
    %c0_33 = arith.constant 0 : index
    %58 = vector.load %arg18[%c0_32, %c0_33] : memref<1x32xf32, #tpu.memory_space<vmem>>, vector<1x32xf32>
    tpu.vector_store %arg18[%c0_32, %c0_33], %57 {strides = array<i32>} : memref<1x32xf32, #tpu.memory_space<vmem>>, vector<1x32xf32>,
    %c0_34 = arith.constant 0 : index
    %c0_35 = arith.constant 0 : index
    %59 = vector.load %arg16[%c0_34, %c0_35] : memref<1x1xf32, #tpu.memory_space<vmem>>, vector<1x1xf32>
    tpu.vector_store %arg16[%c0_34, %c0_35], %38 {strides = array<i32>} : memref<1x1xf32, #tpu.memory_space<vmem>>, vector<1x1xf32>,
    %60 = arith.mulf %33, %28 : vector<16x32xf32>
    %61 = tpu.concatenate %33, %28, %60 in 1 : vector<16x32xf32>, vector<16x32xf32>, vector<16x32xf32> -> vector<16x96xf32>
    %c0_36 = arith.constant 0 : index
    %c0_37 = arith.constant 0 : index
    %c0_38 = arith.constant 0 : index
    %62 = vector.load %arg11[%c0_36, %c0_37, %c0_38] : memref<1x16x128xf32, #tpu.memory_space<vmem>>, vector<1x16x96xf32>
    %63 = vector.shape_cast %62 : vector<1x16x96xf32> to vector<16x96xf32>
    %64 = vector.shape_cast %61 : vector<16x96xf32> to vector<1x16x96xf32>
    tpu.vector_store %arg11[%c0_36, %c0_37, %c0_38], %64 {strides = array<i32>} : memref<1x16x128xf32, #tpu.memory_space<vmem>>, vector<1x16x96xf32>,
    %c0_i32_39 = arith.constant 0 : i32
    %65 = arith.cmpi eq, %arg1, %c0_i32_39 : i32
    %66 = arith.extui %65 : i1 to i32
    %c0_i32_40 = arith.constant 0 : i32
    %67 = arith.cmpi ne, %66, %c0_i32_40 : i32
    scf.if %67 {
      %c0_41 = arith.constant 0 : index
      %c0_42 = arith.constant 0 : index
      %68 = vector.load %arg18[%c0_41, %c0_42] : memref<1x32xf32, #tpu.memory_space<vmem>>, vector<1x32xf32>
      %c0_43 = arith.constant 0 : index
      %c0_44 = arith.constant 0 : index
      %69 = vector.load %arg17[%c0_43, %c0_44] : memref<1x1xf32, #tpu.memory_space<vmem>>, vector<1x1xf32>
      %70 = tpu.reciprocal %69 {approx = true} : vector<1x1xf32> -> vector<1x1xf32>
      %71 = vector.broadcast %70 : vector<1x1xf32> to vector<1x32xf32>
      %72 = arith.mulf %68, %71 : vector<1x32xf32>
      %c0_45 = arith.constant 0 : index
      %c0_46 = arith.constant 0 : index
      %c32 = arith.constant 32 : index
      %73 = vector.load %arg11[%c0_45, %c0_46, %c32] : memref<1x16x128xf32, #tpu.memory_space<vmem>>, vector<1x16x32xf32>
      %74 = vector.shape_cast %73 : vector<1x16x32xf32> to vector<16x32xf32>
      %75 = vector.broadcast %72 : vector<1x32xf32> to vector<16x32xf32>
      %76 = arith.mulf %75, %74 : vector<16x32xf32>
      %c0_47 = arith.constant 0 : index
      %c0_48 = arith.constant 0 : index
      %c96 = arith.constant 96 : index
      %77 = vector.load %arg11[%c0_47, %c0_48, %c96] : memref<1x16x128xf32, #tpu.memory_space<vmem>>, vector<1x16x32xf32>
      %78 = vector.shape_cast %77 : vector<1x16x32xf32> to vector<16x32xf32>
      %79 = vector.shape_cast %76 : vector<16x32xf32> to vector<1x16x32xf32>
      tpu.vector_store %arg11[%c0_47, %c0_48, %c96], %79 {strides = array<i32>} : memref<1x16x128xf32, #tpu.memory_space<vmem>>, vector<1x16x32xf32>,
    } else {
    }
    return
  }
  func.func @transform_0(%arg0: i32, %arg1: i32) -> (i32, i32, i32) {
    %c0_i32 = arith.constant 0 : i32
    %c0_i32_0 = arith.constant 0 : i32
    return %arg0, %arg1, %c0_i32 : i32, i32, i32
  }
  func.func @transform_1(%arg0: i32, %arg1: i32) -> (i32, i32, i32) {
    %c0_i32 = arith.constant 0 : i32
    %c0_i32_0 = arith.constant 0 : i32
    %c0_i32_1 = arith.constant 0 : i32
    return %arg0, %c0_i32, %c0_i32_0 : i32, i32, i32
  }
  func.func @transform_2(%arg0: i32, %arg1: i32) -> (i32, i32, i32) {
    %c0_i32 = arith.constant 0 : i32
    %c0_i32_0 = arith.constant 0 : i32
    %c0_i32_1 = arith.constant 0 : i32
    return %arg0, %c0_i32, %c0_i32_0 : i32, i32, i32
  }
  func.func @transform_3(%arg0: i32, %arg1: i32) -> (i32, i32) {
    %c0_i32 = arith.constant 0 : i32
    %c0_i32_0 = arith.constant 0 : i32
    %c0_i32_1 = arith.constant 0 : i32
    return %c0_i32, %c0_i32_0 : i32, i32
  }
  func.func @transform_4(%arg0: i32, %arg1: i32) -> (i32, i32) {
    %c0_i32 = arith.constant 0 : i32
    %c0_i32_0 = arith.constant 0 : i32
    %c0_i32_1 = arith.constant 0 : i32
    return %c0_i32, %c0_i32_0 : i32, i32
  }
  func.func @transform_5(%arg0: i32, %arg1: i32) -> (i32, i32) {
    %c0_i32 = arith.constant 0 : i32
    %c0_i32_0 = arith.constant 0 : i32
    %c0_i32_1 = arith.constant 0 : i32
    return %c0_i32, %c0_i32_0 : i32, i32
  }
  func.func @transform_6(%arg0: i32, %arg1: i32) -> (i32, i32) {
    %c0_i32 = arith.constant 0 : i32
    %c0_i32_0 = arith.constant 0 : i32
    %c0_i32_1 = arith.constant 0 : i32
    return %c0_i32, %c0_i32_0 : i32, i32
  }
  func.func @transform_7(%arg0: i32, %arg1: i32) -> (i32, i32) {
    %c0_i32 = arith.constant 0 : i32
    %c0_i32_0 = arith.constant 0 : i32
    %c0_i32_1 = arith.constant 0 : i32
    return %c0_i32, %c0_i32_0 : i32, i32
  }
  func.func @transform_8(%arg0: i32, %arg1: i32) -> (i32, i32) {
    %c0_i32 = arith.constant 0 : i32
    %c0_i32_0 = arith.constant 0 : i32
    %c0_i32_1 = arith.constant 0 : i32
    return %c0_i32, %c0_i32_0 : i32, i32
  }
  func.func @transform_9(%arg0: i32, %arg1: i32) -> (i32, i32, i32) {
    %c0_i32 = arith.constant 0 : i32
    %c0_i32_0 = arith.constant 0 : i32
    %c0_i32_1 = arith.constant 0 : i32
    return %arg0, %c0_i32, %c0_i32_0 : i32, i32, i32
  }
  func.func @transform_10(%arg0: i32, %arg1: i32) -> (i32, i32, i32) {
    %c0_i32 = arith.constant 0 : i32
    %c0_i32_0 = arith.constant 0 : i32
    %c0_i32_1 = arith.constant 0 : i32
    return %arg0, %c0_i32, %c0_i32_0 : i32, i32, i32
  }
}

module attributes {stable_mosaic.version = 11 : i64} {
  func.func @_bi_attention_kernel(%arg0: i32, %arg1: i32, %arg2: memref<1x16x32xf32, #tpu.memory_space<vmem>>, %arg3: memref<1x8x32xf32, #tpu.memory_space<vmem>>, %arg4: memref<1x1x8xf32, #tpu.memory_space<vmem>>, %arg5: memref<1x32xf32, #tpu.memory_space<vmem>>, %arg6: memref<1x32xf32, #tpu.memory_space<vmem>>, %arg7: memref<32x32xf32, #tpu.memory_space<vmem>>, %arg8: memref<1x32xf32, #tpu.memory_space<vmem>>, %arg9: memref<32x32xf32, #tpu.memory_space<vmem>>, %arg10: memref<1x32xf32, #tpu.memory_space<vmem>>, %arg11: memref<1x16x128xf32, #tpu.memory_space<vmem>>, %arg12: memref<1x8x32xf32, #tpu.memory_space<vmem>>, %arg13: memref<8x32xf32, #tpu.memory_space<vmem>>, %arg14: memref<8x32xf32, #tpu.memory_space<vmem>>, %arg15: memref<1x8xf32, #tpu.memory_space<vmem>>, %arg16: memref<1x1xf32, #tpu.memory_space<vmem>>, %arg17: memref<1x1xf32, #tpu.memory_space<vmem>>, %arg18: memref<1x32xf32, #tpu.memory_space<vmem>>) attributes {dimension_semantics = [#tpu.dimension_semantics<parallel>, #tpu.dimension_semantics<arbitrary>], iteration_bounds = array<i64: 2, 1>, scalar_prefetch = 0 : i64, scratch_operands = 6 : i64, tpu.core_type = #tpu.core_type<tc>, window_params = [{transform_indices = @transform_0, window_bounds = array<i64: 1, 16, 32>}, {transform_indices = @transform_1, window_bounds = array<i64: 1, 8, 32>}, {transform_indices = @transform_2, window_bounds = array<i64: 1, 1, 8>}, {pipeline_mode = #tpu.pipeline_mode<synchronous>, transform_indices = @transform_3, window_bounds = array<i64: 1, 32>}, {pipeline_mode = #tpu.pipeline_mode<synchronous>, transform_indices = @transform_4, window_bounds = array<i64: 1, 32>}, {pipeline_mode = #tpu.pipeline_mode<synchronous>, transform_indices = @transform_5, window_bounds = array<i64: 32, 32>}, {pipeline_mode = #tpu.pipeline_mode<synchronous>, transform_indices = @transform_6, window_bounds = array<i64: 1, 32>}, {pipeline_mode = #tpu.pipeline_mode<synchronous>, transform_indices = @transform_7, window_bounds = array<i64: 32, 32>}, {pipeline_mode = #tpu.pipeline_mode<synchronous>, transform_indices = @transform_8, window_bounds = array<i64: 1, 32>}, {transform_indices = @transform_9, window_bounds = array<i64: 1, 16, 128>}, {transform_indices = @transform_10, window_bounds = array<i64: 1, 8, 32>}]} {
    %c0_i32 = arith.constant 0 : i32
    %0 = arith.cmpi eq, %arg1, %c0_i32 : i32
    %1 = arith.extui %0 : i1 to i32
    %c0_i32_0 = arith.constant 0 : i32
    %2 = arith.cmpi ne, %1, %c0_i32_0 : i32
    scf.if %2 {
      %c0_41 = arith.constant 0 : index
      %c0_42 = arith.constant 0 : index
      %c0_43 = arith.constant 0 : index
      %68 = vector.load %arg3[%c0_41, %c0_42, %c0_43] : memref<1x8x32xf32, #tpu.memory_space<vmem>>, vector<1x8x32xf32>
      %69 = vector.shape_cast %68 : vector<1x8x32xf32> to vector<8x32xf32>
      %c0_44 = arith.constant 0 : index
      %c0_45 = arith.constant 0 : index
      %70 = vector.load %arg13[%c0_44, %c0_45] : memref<8x32xf32, #tpu.memory_space<vmem>>, vector<8x32xf32>
      tpu.vector_store %arg13[%c0_44, %c0_45], %69 {strides = array<i32>} : memref<8x32xf32, #tpu.memory_space<vmem>>, vector<8x32xf32>,
      %c0_46 = arith.constant 0 : index
      %c0_47 = arith.constant 0 : index
      %71 = vector.load %arg6[%c0_46, %c0_47] : memref<1x32xf32, #tpu.memory_space<vmem>>, vector<1x32xf32>
      %72 = vector.broadcast %71 : vector<1x32xf32> to vector<8x32xf32>
      %73 = arith.mulf %69, %72 : vector<8x32xf32>
      %cst_48 = arith.constant dense<0.000000e+00> : vector<8xf32>
      %74 = vector.multi_reduction <add>, %73, %cst_48 [1] : vector<8x32xf32> to vector<8xf32>
      %75 = vector.shape_cast %74 : vector<8xf32> to vector<8x1xf32>
      %76 = tpu.transpose %75, [1, 0] : vector<8x1xf32> -> vector<1x8xf32>
      %c0_49 = arith.constant 0 : index
      %c0_50 = arith.constant 0 : index
      %c0_51 = arith.constant 0 : index
      %77 = vector.load %arg4[%c0_49, %c0_50, %c0_51] : memref<1x1x8xf32, #tpu.memory_space<vmem>>, vector<1x1x8xf32>
      %78 = vector.shape_cast %77 : vector<1x1x8xf32> to vector<1x8xf32>
      %cst_52 = arith.constant 1.000000e+00 : f32
      %79 = vector.broadcast %cst_52 : f32 to vector<1x8xf32>
      %80 = arith.subf %78, %79 : vector<1x8xf32>
      %cst_53 = arith.constant 1.000000e+30 : f32
      %81 = vector.broadcast %cst_53 : f32 to vector<1x8xf32>
      %82 = arith.mulf %81, %80 : vector<1x8xf32>
      %83 = arith.addf %76, %82 : vector<1x8xf32>
      %c0_54 = arith.constant 0 : index
      %c0_55 = arith.constant 0 : index
      %84 = vector.load %arg15[%c0_54, %c0_55] : memref<1x8xf32, #tpu.memory_space<vmem>>, vector<1x8xf32>
      tpu.vector_store %arg15[%c0_54, %c0_55], %83 {strides = array<i32>} : memref<1x8xf32, #tpu.memory_space<vmem>>, vector<1x8xf32>,
      %c0_56 = arith.constant 0 : index
      %c0_57 = arith.constant 0 : index
      %85 = vector.load %arg13[%c0_56, %c0_57] : memref<8x32xf32, #tpu.memory_space<vmem>>, vector<8x32xf32>
      %c0_58 = arith.constant 0 : index
      %c0_59 = arith.constant 0 : index
      %86 = vector.load %arg9[%c0_58, %c0_59] : memref<32x32xf32, #tpu.memory_space<vmem>>, vector<32x32xf32>
      %cst_60 = arith.constant dense<0.000000e+00> : vector<8x32xf32>
      %87 = tpu.matmul %85, %86, %cst_60 {dimension_numbers = #tpu.dot_dimension_numbers<[1], [0], [0], [1], [0, 0, 1, 1], [], []>} : vector<8x32xf32>, vector<32x32xf32>, vector<8x32xf32> -> vector<8x32xf32>
      %c0_61 = arith.constant 0 : index
      %c0_62 = arith.constant 0 : index
      %88 = vector.load %arg10[%c0_61, %c0_62] : memref<1x32xf32, #tpu.memory_space<vmem>>, vector<1x32xf32>
      %89 = vector.broadcast %88 : vector<1x32xf32> to vector<8x32xf32>
      %90 = arith.addf %87, %89 : vector<8x32xf32>
      %c0_63 = arith.constant 0 : index
      %c0_64 = arith.constant 0 : index
      %c0_65 = arith.constant 0 : index
      %91 = vector.load %arg12[%c0_63, %c0_64, %c0_65] : memref<1x8x32xf32, #tpu.memory_space<vmem>>, vector<1x8x32xf32>
      %92 = vector.shape_cast %91 : vector<1x8x32xf32> to vector<8x32xf32>
      %93 = vector.shape_cast %90 : vector<8x32xf32> to vector<1x8x32xf32>
      tpu.vector_store %arg12[%c0_63, %c0_64, %c0_65], %93 {strides = array<i32>} : memref<1x8x32xf32, #tpu.memory_space<vmem>>, vector<1x8x32xf32>,
      %c0_66 = arith.constant 0 : index
      %c0_67 = arith.constant 0 : index
      %94 = vector.load %arg14[%c0_66, %c0_67] : memref<8x32xf32, #tpu.memory_space<vmem>>, vector<8x32xf32>
      tpu.vector_store %arg14[%c0_66, %c0_67], %90 {strides = array<i32>} : memref<8x32xf32, #tpu.memory_space<vmem>>, vector<8x32xf32>,
      %cst_68 = arith.constant 0xFF800000 : f32
      %95 = vector.broadcast %cst_68 : f32 to vector<1x1xf32>
      %c0_69 = arith.constant 0 : index
      %c0_70 = arith.constant 0 : index
      %96 = vector.load %arg16[%c0_69, %c0_70] : memref<1x1xf32, #tpu.memory_space<vmem>>, vector<1x1xf32>
      tpu.vector_store %arg16[%c0_69, %c0_70], %95 {strides = array<i32>} : memref<1x1xf32, #tpu.memory_space<vmem>>, vector<1x1xf32>,
      %cst_71 = arith.constant 0.000000e+00 : f32
      %97 = vector.broadcast %cst_71 : f32 to vector<1x1xf32>
      %c0_72 = arith.constant 0 : index
      %c0_73 = arith.constant 0 : index
      %98 = vector.load %arg17[%c0_72, %c0_73] : memref<1x1xf32, #tpu.memory_space<vmem>>, vector<1x1xf32>
      tpu.vector_store %arg17[%c0_72, %c0_73], %97 {strides = array<i32>} : memref<1x1xf32, #tpu.memory_space<vmem>>, vector<1x1xf32>,
      %cst_74 = arith.constant 0.000000e+00 : f32
      %99 = vector.broadcast %cst_74 : f32 to vector<1x32xf32>
      %c0_75 = arith.constant 0 : index
      %c0_76 = arith.constant 0 : index
      %100 = vector.load %arg18[%c0_75, %c0_76] : memref<1x32xf32, #tpu.memory_space<vmem>>, vector<1x32xf32>
      tpu.vector_store %arg18[%c0_75, %c0_76], %99 {strides = array<i32>} : memref<1x32xf32, #tpu.memory_space<vmem>>, vector<1x32xf32>,
    } else {
    }
    %c0 = arith.constant 0 : index
    %c0_1 = arith.constant 0 : index
    %c0_2 = arith.constant 0 : index
    %3 = vector.load %arg2[%c0, %c0_1, %c0_2] : memref<1x16x32xf32, #tpu.memory_space<vmem>>, vector<1x16x32xf32>
    %4 = vector.shape_cast %3 : vector<1x16x32xf32> to vector<16x32xf32>
    %c0_3 = arith.constant 0 : index
    %c0_4 = arith.constant 0 : index
    %5 = vector.load %arg5[%c0_3, %c0_4] : memref<1x32xf32, #tpu.memory_space<vmem>>, vector<1x32xf32>
    %6 = vector.broadcast %5 : vector<1x32xf32> to vector<16x32xf32>
    %7 = arith.mulf %4, %6 : vector<16x32xf32>
    %cst = arith.constant dense<0.000000e+00> : vector<16xf32>
    %8 = vector.multi_reduction <add>, %7, %cst [1] : vector<16x32xf32> to vector<16xf32>
    %9 = vector.shape_cast %8 : vector<16xf32> to vector<16x1xf32>
    %cst_5 = arith.constant 0.176776692 : f32
    %10 = vector.broadcast %cst_5 : f32 to vector<16x32xf32>
    %11 = arith.mulf %4, %10 : vector<16x32xf32>
    %c0_6 = arith.constant 0 : index
    %c0_7 = arith.constant 0 : index
    %12 = vector.load %arg13[%c0_6, %c0_7] : memref<8x32xf32, #tpu.memory_space<vmem>>, vector<8x32xf32>
    %cst_8 = arith.constant dense<0.000000e+00> : vector<16x8xf32>
    %13 = tpu.matmul %11, %12, %cst_8 {dimension_numbers = #tpu.dot_dimension_numbers<[1], [1], [0], [0], [0, 0, 1, 0], [], []>} : vector<16x32xf32>, vector<8x32xf32>, vector<16x8xf32> -> vector<16x8xf32>
    %c0_9 = arith.constant 0 : index
    %c0_10 = arith.constant 0 : index
    %14 = vector.load %arg15[%c0_9, %c0_10] : memref<1x8xf32, #tpu.memory_space<vmem>>, vector<1x8xf32>
    %15 = vector.broadcast %14 : vector<1x8xf32> to vector<16x8xf32>
    %16 = arith.addf %13, %15 : vector<16x8xf32>
    %cst_11 = arith.constant dense<0xFF800000> : vector<16xf32>
    %17 = vector.multi_reduction <maximumf>, %16, %cst_11 [1] : vector<16x8xf32> to vector<16xf32>
    %18 = vector.shape_cast %17 : vector<16xf32> to vector<16x1xf32>
    %19 = vector.broadcast %18 : vector<16x1xf32> to vector<16x8xf32>
    %20 = arith.subf %16, %19 : vector<16x8xf32>
    %21 = math.exp %20 : vector<16x8xf32>
    %cst_12 = arith.constant dense<0.000000e+00> : vector<16xf32>
    %22 = vector.multi_reduction <add>, %21, %cst_12 [1] : vector<16x8xf32> to vector<16xf32>
    %23 = vector.shape_cast %22 : vector<16xf32> to vector<16x1xf32>
    %c0_13 = arith.constant 0 : index
    %c0_14 = arith.constant 0 : index
    %24 = vector.load %arg14[%c0_13, %c0_14] : memref<8x32xf32, #tpu.memory_space<vmem>>, vector<8x32xf32>
    %cst_15 = arith.constant dense<0.000000e+00> : vector<16x32xf32>
    %25 = tpu.matmul %21, %24, %cst_15 {dimension_numbers = #tpu.dot_dimension_numbers<[1], [0], [0], [1], [0, 0, 1, 1], [], []>} : vector<16x8xf32>, vector<8x32xf32>, vector<16x32xf32> -> vector<16x32xf32>
    %26 = tpu.reciprocal %23 {approx = true} : vector<16x1xf32> -> vector<16x1xf32>
    %27 = vector.broadcast %26 : vector<16x1xf32> to vector<16x32xf32>
    %28 = arith.mulf %25, %27 : vector<16x32xf32>
    %c0_16 = arith.constant 0 : index
    %c0_17 = arith.constant 0 : index
    %29 = vector.load %arg7[%c0_16, %c0_17] : memref<32x32xf32, #tpu.memory_space<vmem>>, vector<32x32xf32>
    %cst_18 = arith.constant dense<0.000000e+00> : vector<16x32xf32>
    %30 = tpu.matmul %4, %29, %cst_18 {dimension_numbers = #tpu.dot_dimension_numbers<[1], [0], [0], [1], [0, 0, 1, 1], [], []>} : vector<16x32xf32>, vector<32x32xf32>, vector<16x32xf32> -> vector<16x32xf32>
    %c0_19 = arith.constant 0 : index
    %c0_20 = arith.constant 0 : index
    %31 = vector.load %arg8[%c0_19, %c0_20] : memref<1x32xf32, #tpu.memory_space<vmem>>, vector<1x32xf32>
    %32 = vector.broadcast %31 : vector<1x32xf32> to vector<16x32xf32>
    %33 = arith.addf %30, %32 : vector<16x32xf32>
    %34 = arith.addf %18, %9 : vector<16x1xf32>
    %c0_21 = arith.constant 0 : index
    %c0_22 = arith.constant 0 : index
    %35 = vector.load %arg16[%c0_21, %c0_22] : memref<1x1xf32, #tpu.memory_space<vmem>>, vector<1x1xf32>
    %cst_23 = arith.constant dense<0xFF800000> : vector<1xf32>
    %36 = vector.multi_reduction <maximumf>, %34, %cst_23 [0] : vector<16x1xf32> to vector<1xf32>
    %37 = vector.shape_cast %36 : vector<1xf32> to vector<1x1xf32>
    %38 = arith.maximumf %35, %37 : vector<1x1xf32>
    %39 = arith.subf %35, %38 : vector<1x1xf32>
    %40 = math.exp %39 : vector<1x1xf32>
    %41 = vector.broadcast %38 : vector<1x1xf32> to vector<16x1xf32>
    %42 = arith.subf %34, %41 : vector<16x1xf32>
    %43 = math.exp %42 : vector<16x1xf32>
    %c0_24 = arith.constant 0 : index
    %c0_25 = arith.constant 0 : index
    %44 = vector.load %arg17[%c0_24, %c0_25] : memref<1x1xf32, #tpu.memory_space<vmem>>, vector<1x1xf32>
    %45 = arith.mulf %40, %44 : vector<1x1xf32>
    %cst_26 = arith.constant dense<0.000000e+00> : vector<1xf32>
    %46 = vector.multi_reduction <add>, %43, %cst_26 [0] : vector<16x1xf32> to vector<1xf32>
    %47 = vector.shape_cast %46 : vector<1xf32> to vector<1x1xf32>
    %48 = arith.addf %45, %47 : vector<1x1xf32>
    %c0_27 = arith.constant 0 : index
    %c0_28 = arith.constant 0 : index
    %49 = vector.load %arg17[%c0_27, %c0_28] : memref<1x1xf32, #tpu.memory_space<vmem>>, vector<1x1xf32>
    tpu.vector_store %arg17[%c0_27, %c0_28], %48 {strides = array<i32>} : memref<1x1xf32, #tpu.memory_space<vmem>>, vector<1x1xf32>,
    %c0_29 = arith.constant 0 : index
    %c0_30 = arith.constant 0 : index
    %50 = vector.load %arg18[%c0_29, %c0_30] : memref<1x32xf32, #tpu.memory_space<vmem>>, vector<1x32xf32>
    %51 = vector.broadcast %40 : vector<1x1xf32> to vector<1x32xf32>
    %52 = arith.mulf %51, %50 : vector<1x32xf32>
    %53 = vector.broadcast %43 : vector<16x1xf32> to vector<16x32xf32>
    %54 = arith.mulf %53, %33 : vector<16x32xf32>
    %cst_31 = arith.constant dense<0.000000e+00> : vector<32xf32>
    %55 = vector.multi_reduction <add>, %54, %cst_31 [0] : vector<16x32xf32> to vector<32xf32>
    %56 = vector.shape_cast %55 : vector<32xf32> to vector<1x32xf32>
    %57 = arith.addf %52, %56 : vector<1x32xf32>
    %c0_32 = arith.constant 0 : index
    %c0_33 = arith.constant 0 : index
    %58 = vector.load %arg18[%c0_32, %c0_33] : memref<1x32xf32, #tpu.memory_space<vmem>>, vector<1x32xf32>
    tpu.vector_store %arg18[%c0_32, %c0_33], %57 {strides = array<i32>} : memref<1x32xf32, #tpu.memory_space<vmem>>, vector<1x32xf32>,
    %c0_34 = arith.constant 0 : index
    %c0_35 = arith.constant 0 : index
    %59 = vector.load %arg16[%c0_34, %c0_35] : memref<1x1xf32, #tpu.memory_space<vmem>>, vector<1x1xf32>
    tpu.vector_store %arg16[%c0_34, %c0_35], %38 {strides = array<i32>} : memref<1x1xf32, #tpu.memory_space<vmem>>, vector<1x1xf32>,
    %60 = arith.mulf %33, %28 : vector<16x32xf32>
    %61 = tpu.concatenate %33, %28, %60 in 1 : vector<16x32xf32>, vector<16x32xf32>, vector<16x32xf32> -> vector<16x96xf32>
    %c0_36 = arith.constant 0 : index
    %c0_37 = arith.constant 0 : index
    %c0_38 = arith.constant 0 : index
    %62 = vector.load %arg11[%c0_36, %c0_37, %c0_38] : memref<1x16x128xf32, #tpu.memory_space<vmem>>, vector<1x16x96xf32>
    %63 = vector.shape_cast %62 : vector<1x16x96xf32> to vector<16x96xf32>
    %64 = vector.shape_cast %61 : vector<16x96xf32> to vector<1x16x96xf32>
    tpu.vector_store %arg11[%c0_36, %c0_37, %c0_38], %64 {strides = array<i32>} : memref<1x16x128xf32, #tpu.memory_space<vmem>>, vector<1x16x96xf32>,
    %c0_i32_39 = arith.constant 0 : i32
    %65 = arith.cmpi eq, %arg1, %c0_i32_39 : i32
    %66 = arith.extui %65 : i1 to i32
    %c0_i32_40 = arith.constant 0 : i32
    %67 = arith.cmpi ne, %66, %c0_i32_40 : i32
    scf.if %67 {
      %c0_41 = arith.constant 0 : index
      %c0_42 = arith.constant 0 : index
      %68 = vector.load %arg18[%c0_41, %c0_42] : memref<1x32xf32, #tpu.memory_space<vmem>>, vector<1x32xf32>
      %c0_43 = arith.constant 0 : index
      %c0_44 = arith.constant 0 : index
      %69 = vector.load %arg17[%c0_43, %c0_44] : memref<1x1xf32, #tpu.memory_space<vmem>>, vector<1x1xf32>
      %70 = tpu.reciprocal %69 {approx = true} : vector<1x1xf32> -> vector<1x1xf32>
      %71 = vector.broadcast %70 : vector<1x1xf32> to vector<1x32xf32>
      %72 = arith.mulf %68, %71 : vector<1x32xf32>
      %c0_45 = arith.constant 0 : index
      %c0_46 = arith.constant 0 : index
      %c32 = arith.constant 32 : index
      %73 = vector.load %arg11[%c0_45, %c0_46, %c32] : memref<1x16x128xf32, #tpu.memory_space<vmem>>, vector<1x16x32xf32>
      %74 = vector.shape_cast %73 : vector<1x16x32xf32> to vector<16x32xf32>
      %75 = vector.broadcast %72 : vector<1x32xf32> to vector<16x32xf32>
      %76 = arith.mulf %75, %74 : vector<16x32xf32>
      %c0_47 = arith.constant 0 : index
      %c0_48 = arith.constant 0 : index
      %c96 = arith.constant 96 : index
      %77 = vector.load %arg11[%c0_47, %c0_48, %c96] : memref<1x16x128xf32, #tpu.memory_space<vmem>>, vector<1x16x32xf32>
      %78 = vector.shape_cast %77 : vector<1x16x32xf32> to vector<16x32xf32>
      %79 = vector.shape_cast %76 : vector<16x32xf32> to vector<1x16x32xf32>
      tpu.vector_store %arg11[%c0_47, %c0_48, %c96], %79 {strides = array<i32>} : memref<1x16x128xf32, #tpu.memory_space<vmem>>, vector<1x16x32xf32>,
    } else {
    }
    return
  }
  func.func @transform_0(%arg0: i32, %arg1: i32) -> (i32, i32, i32) {
    %c0_i32 = arith.constant 0 : i32
    %c0_i32_0 = arith.constant 0 : i32
    return %arg0, %arg1, %c0_i32 : i32, i32, i32
  }
  func.func @transform_1(%arg0: i32, %arg1: i32) -> (i32, i32, i32) {
    %c0_i32 = arith.constant 0 : i32
    %c0_i32_0 = arith.constant 0 : i32
    %c0_i32_1 = arith.constant 0 : i32
    return %arg0, %c0_i32, %c0_i32_0 : i32, i32, i32
  }
  func.func @transform_2(%arg0: i32, %arg1: i32) -> (i32, i32, i32) {
    %c0_i32 = arith.constant 0 : i32
    %c0_i32_0 = arith.constant 0 : i32
    %c0_i32_1 = arith.constant 0 : i32
    return %arg0, %c0_i32, %c0_i32_0 : i32, i32, i32
  }
  func.func @transform_3(%arg0: i32, %arg1: i32) -> (i32, i32) {
    %c0_i32 = arith.constant 0 : i32
    %c0_i32_0 = arith.constant 0 : i32
    %c0_i32_1 = arith.constant 0 : i32
    return %c0_i32, %c0_i32_0 : i32, i32
  }
  func.func @transform_4(%arg0: i32, %arg1: i32) -> (i32, i32) {
    %c0_i32 = arith.constant 0 : i32
    %c0_i32_0 = arith.constant 0 : i32
    %c0_i32_1 = arith.constant 0 : i32
    return %c0_i32, %c0_i32_0 : i32, i32
  }
  func.func @transform_5(%arg0: i32, %arg1: i32) -> (i32, i32) {
    %c0_i32 = arith.constant 0 : i32
    %c0_i32_0 = arith.constant 0 : i32
    %c0_i32_1 = arith.constant 0 : i32
    return %c0_i32, %c0_i32_0 : i32, i32
  }
  func.func @transform_6(%arg0: i32, %arg1: i32) -> (i32, i32) {
    %c0_i32 = arith.constant 0 : i32
    %c0_i32_0 = arith.constant 0 : i32
    %c0_i32_1 = arith.constant 0 : i32
    return %c0_i32, %c0_i32_0 : i32, i32
  }
  func.func @transform_7(%arg0: i32, %arg1: i32) -> (i32, i32) {
    %c0_i32 = arith.constant 0 : i32
    %c0_i32_0 = arith.constant 0 : i32
    %c0_i32_1 = arith.constant 0 : i32
    return %c0_i32, %c0_i32_0 : i32, i32
  }
  func.func @transform_8(%arg0: i32, %arg1: i32) -> (i32, i32) {
    %c0_i32 = arith.constant 0 : i32
    %c0_i32_0 = arith.constant 0 : i32
    %c0_i32_1 = arith.constant 0 : i32
    return %c0_i32, %c0_i32_0 : i32, i32
  }
  func.func @transform_9(%arg0: i32, %arg1: i32) -> (i32, i32, i32) {
    %c0_i32 = arith.constant 0 : i32
    %c0_i32_0 = arith.constant 0 : i32
    %c0_i32_1 = arith.constant 0 : i32
    return %arg0, %c0_i32, %c0_i32_0 : i32, i32, i32
  }
  func.func @transform_10(%arg0: i32, %arg1: i32) -> (i32, i32, i32) {
    %c0_i32 = arith.constant 0 : i32
    %c0_i32_0 = arith.constant 0 : i32
    %c0_i32_1 = arith.constant 0 : i32
    return %arg0, %c0_i32, %c0_i32_0 : i32, i32, i32
  }
}

</mosaic_0001>

<bundles_post_ra>
// kernel: tpu_custom_call.1
= control target key start
LH: loop header
LB: loop body
LE: loop exit
PB: predicated region body
PF: predicated region fallthrough
CT: control target
= control target key end

     0   :  { %s1885_s0 = inlined_call_operand.hbm [shape: f32[2,16,32], index: 0, kind: input, shape index: {}]   ;;  %s1886_s1 = inlined_call_operand.hbm [shape: f32[2,8,32], index: 1, kind: input, shape index: {}]   ;;  %s1887_s2 = inlined_call_operand.hbm [shape: f32[2,1,8], index: 2, kind: input, shape index: {}]   ;;  %s1888_s3 = inlined_call_operand.vmem [shape: f32[1,32], index: 3, kind: input, shape index: {}]   ;;  %s1889_s4 = inlined_call_operand.vmem [shape: f32[1,32], index: 4, kind: input, shape index: {}]   ;;  %s1890_s5 = inlined_call_operand.hbm [shape: f32[32,32], index: 5, kind: input, shape index: {}]   ;;  %s1891_s6 = inlined_call_operand.vmem [shape: f32[1,32], index: 6, kind: input, shape index: {}]   ;;  %s1892_s7 = inlined_call_operand.hbm [shape: f32[32,32], index: 7, kind: input, shape index: {}]   ;;  %s1893_s8 = inlined_call_operand.vmem [shape: f32[1,32], index: 8, kind: input, shape index: {}]   ;;  %s1894_s9 = inlined_call_operand.hbm [shape: f32[2,16,128], index: 9, kind: output, shape index: {0}]   ;;  %s1895_s10 = inlined_call_operand.hbm [shape: f32[2,8,32], index: 10, kind: output, shape index: {1}]  }
   0x1   :  { %1910 = sst [smem:[#allocation32_spill]] %s1886_s1 }
   0x2   :  { %1911 = sst [smem:[#allocation33_spill]] %s1890_s5 }
   0x3   :  { %1912 = sst [smem:[#allocation34_spill]] %s1892_s7 }
   0x4   :  { %1913 = sst [smem:[#allocation35_spill]] %s1894_s9 }
   0x5   :  { %1914 = sst [smem:[#allocation36_spill]] %s1895_s10 }
   0x6   :  { %16 = vsyncpa [#allocation9], 0 }
   0x7   :  { %18 = vsyncpa [#allocation9 + $0x1], 0 }
   0x8   :  { %19 = vsyncpa [#allocation12], 0 }
   0x9   :  { %21 = vsyncpa [#allocation12 + $0x1], 0 }
   0xa   :  { %22 = vsyncpa [#allocation15], 0 }
   0xb   :  { %23 = vsyncpa [#allocation10], 0 }
   0xc   :  { %25 = vsyncpa [#allocation10 + $0x1], 0 }
   0xd   :  { %26 = vsyncpa [#allocation19], 0 }
   0xe   :  { %28 = vsyncpa [#allocation19 + $0x1], 0  ;;  %s1603_s13 = smov 0   ;;  %s1605_s14 = smov 0  }
   0xf   :  { %s1607_s15 = smov 0   ;;  %s1609_s16 = smov 0  }
  0x10   :  { %s1611_s17 = smov 0   ;;  %s1613_s18 = smov 0  }
  0x11 LB: > { %1915 = sst [smem:[#allocation25_spill]] %s1514_s13  ;;  %s1634_s19 = sadd.s32 4294967295, %s1534_s18   ;;  %s1534_s18 = sphi %s1613_s18, %s34_s18   ;;  %s1530_s17 = sphi %s1611_s17, %s1947_s17   ;;  %s1526_s16 = sphi %s1609_s16, %s1946_s16   ;;  %s1522_s15 = sphi %s1607_s15, %s1942_s15   ;;  %s1518_s14 = sphi %s1605_s14, %s1945_s14   ;;  %s1514_s13 = sphi %s1603_s13, %s1944_s13  }
  0x12   : > { %1916 = sst [smem:[#allocation26_spill]] %s1522_s15  ;;  %p1096_p0 = scmp.ge.s32.totalorder %s1534_s18, 1 }
  0x13   : > { %1917 = sst [smem:[#allocation27_spill]] %s1534_s18  ;;  %p69_p1 = scmp.eq.s32.totalorder %s1634_s19, 0 }
  0x14   : > { %p309_p2 = scmp.lt.s32.totalorder %s1534_s18, 3  ;;  %s1918_s5 = sld [smem:[#allocation33_spill]] }
  0x15   : > { %s1536_s24 = smov [#allocation14]   ;;  %s1896_s27 = smov 128  }
  0x16   : > { %p1642_p3 = pnand %p1096_p0, %p309_p2  ;;  %s328_s25 = sshll.u32 %s1536_s24, 4  ;;  %s329_s25 = int_to_ptr.vmem [resolvable:$true] %s328_s25 }
  0x17   : > { %s1898_s28 = smov 8   ;;  %s1095_s29 = sadd.s32 4294967294, %s1534_s18  }
  0x18   : > { %p1148_p4 = pneg %p1642_p3  ;;  %s46_s30 = sadd.s32 1, %s1530_s17 }
  0x19   : > { %s55_s11 = sadd.s32 1, %s1522_s15  ;;  %p48_p7 = scmp.ge.s32.totalorder %s46_s30, 2 }
  0x1a   : > { %s326_s22 = sshll.u32 %s1918_s5, 4  ;;  %p1650_p5 = pnand %p1148_p4, %p69_p1  ;;  %s327_s22 = int_to_ptr.hbm [resolvable:$true] %s326_s22 }
  0x1b   : > { %p62_p8 = scmp.ne.s32.totalorder %s1522_s15, %s1518_s14  ;;  %p63_p9 = scmp.eq.s32.totalorder %s1534_s18, 0 }
  0x1c   : > { %1151 = dma.hbm_to_vmem [thread:$0]  (!%p1650_p5), %s327_s22, 512, %s329_s25, [#allocation15], %s1896_s27, %s1896_s27, %s1898_s28  }
  0x1d   : > { %p68_p10 = scmp.ne.s32.totalorder %s1518_s14, %s1514_s13  ;;  %s1949_s30 = smov (%p48_p7, %s46_s30), 0 }
  0x1e   : > { %1921 = sst [smem:[#allocation28_spill]] %s1949_s30  ;;  %p64_p11 = por %p63_p9, %p62_p8 }
  0x1f   : > { %p1672_p12 = por %p69_p1, %p68_p10  ;;  %s50_s20 = ssub.s32 %s1530_s17, %s1949_s30 }
  0x20   : > { %p270_p13 = scmp.eq.s32.totalorder %s1634_s19, 1  ;;  %p53_p0 = scmp.eq.s32.totalorder %s50_s20, 0 }
  0x21   : > { %p276_p2 = scmp.eq.s32.totalorder %s1095_s29, 1  ;;  %p1174_p6 = scmp.lt.s32.totalorder %s1534_s18, 2 }
  0x22   : > { %p1679_p4 = por %p270_p13, %p62_p8  ;;  %s1692_s25 = sand.u32 1, %s1522_s15  }
  0x23   : > { %s1685_s22 = scalar_select %p53_p0, %s1522_s15, %s55_s11  }
  0x24   : > { %s1923_s21 = scalar_select %p1679_p4, 1, 0 }
  0x25   : > { %1925 = sst [smem:[#allocation30_spill]] %s1685_s22  ;;  %p1687_p7 = por %p276_p2, %p68_p10 }
  0x26   : > { %1924 = sst [smem:[#allocation29_spill]] %s1923_s21  ;;  %p1694_p9 = pnand %p1174_p6, %p64_p11 }
  0x27   : > { %s1926_s24 = scalar_select %p1687_p7, 1, 0 }
  0x28   : > { %s386_s29 = sand.u32 1, %s1534_s18   ;;  %s1103_s20 = sshll.u32 %s1692_s25, 3 }
  0x29   : > { %1927 = sst [smem:[#allocation31_spill]] %s1926_s24  ;;  %s1104_s28 = sshll.u32 %s1530_s17, 3 }
  0x2a   : > { %s390_s11 = scalar_lea.vmem [#allocation11], %s1103_s20  ;;  %s1929_s1 = sld [smem:[#allocation32_spill]] }
  0x2b   : > { %s398_s5 = sshll.u32 %s390_s11, 4  ;;  %s1930_s7 = sld [smem:[#allocation34_spill]]  ;;  %s399_s5 = int_to_ptr.vmem [resolvable:$true] %s398_s5 }
  0x2c   : > { %s387_s18 = scalar_lea.sflag [#allocation12], %s386_s29  ;;  %s1539_s20 = smov [#allocation16]  }
  0x2d   : > { %s345_s11 = sshll.u32 %s1539_s20, 4  ;;  %s1100_s21 = sshll.u32 %s1692_s25, 4  ;;  %s346_s11 = int_to_ptr.vmem [resolvable:$true] %s345_s11 }
  0x2e   : > { %s1932_s30 = smov 128   ;;  %s1128_s9 = sshll.u32 %s1530_s17, 4 }
  0x2f   : > { %s366_s13 = scalar_lea.vmem [#allocation8], %s1100_s21  ;;  %s373_s29 = scalar_lea.hbm %s1885_s0, %s1128_s9 }
  0x30   : > { %s394_s24 = scalar_lea.hbm %s1929_s1, %s1104_s28  ;;  %s1931_s28 = smov 8  }
  0x31   : > { %s396_s15 = sshll.u32 %s394_s24, 4  ;;  %s343_s10 = sshll.u32 %s1930_s7, 4  ;;  %s397_s15 = int_to_ptr.hbm [resolvable:$true] %s396_s15  ;;  %s344_s10 = int_to_ptr.hbm [resolvable:$true] %s343_s10 }
  0x32   : > { %1161 = dma.hbm_to_vmem [thread:$0]  (!%p1694_p9), %s397_s15, 128, %s399_s5, %s387_s18  }
  0x33   : > { %1154 = dma.hbm_to_vmem [thread:$0]  (!%p1650_p5), %s344_s10, 512, %s346_s11, [#allocation15], %s1932_s30, %s1932_s30, %s1931_s28  }
  0x34   : > { %s376_s22 = sshll.u32 %s366_s13, 4  ;;  %s374_s5 = sshll.u32 %s373_s29, 4  ;;  %s377_s22 = int_to_ptr.vmem [resolvable:$true] %s376_s22  ;;  %s375_s5 = int_to_ptr.hbm [resolvable:$true] %s374_s5 }
  0x35   : > { %s411_s7 = scalar_lea.hbm %s1887_s2, %s1530_s17  ;;  %s363_s26 = scalar_lea.sflag [#allocation9], %s1692_s25 }
  0x36   : > { %1158 = dma.hbm_to_vmem [thread:$0]  (!%p1694_p9), %s375_s5, 256, %s377_s22, %s363_s26, %s1932_s30, %s1932_s30, %s1931_s28  }
  0x37   : > { %s413_s10 = sshll.u32 %s411_s7, 4  ;;  %s408_s21 = scalar_lea.vmem [#allocation13], %s1692_s25  ;;  %s414_s10 = int_to_ptr.hbm [resolvable:$true] %s413_s10 }
  0x38   : > { %s415_s11 = sshll.u32 %s408_s21, 4  ;;  %424 = sbr.rel (%p1642_p3) target bundleno = 988 (0x3dc), region = 56  ;;  %s416_s11 = int_to_ptr.vmem [resolvable:$true] %s415_s11 }
  0x39   : > { %1164 = dma.hbm_to_vmem [thread:$0]  (!%p1694_p9), %s414_s10, 16, %s416_s11, %s387_s18  }
  0x3a   : > { %s1735_s1 = sand.u32 (!%p1642_p3), 1, %s1518_s14  }
  0x3b   : > { %s1106_s9 = sshll.u32 (!%p1642_p3), %s1735_s1, 4  ;;  %s427_s13 = scalar_lea.sflag (!%p1642_p3), [#allocation9], %s1735_s1 }
  0x3c   : > { %s430_s7 = scalar_lea.vmem (!%p1642_p3), [#allocation8], %s1106_s9 }
  0x3d   : > { %1493 = dma.done.wait (%p1672_p12), %s427_s13, 256  }
  0x3e   : > { %1495 = vsyncadd (%p1672_p12), %s427_s13, 4294967040  ;;  %s436_s18 = sand.u32 1, %s1634_s19   ;;  %s1107_s23 = sshll.u32 %s1735_s1, 3 }
  0x3f   : > { %s437_s27 = scalar_lea.sflag [#allocation12], %s436_s18  ;;  %s440_s25 = scalar_lea.vmem [#allocation11], %s1107_s23 }
  0x40   : > { %1497 = dma.done.wait (%p1672_p12), %s437_s27, 144  }
  0x41   : > { %1499 = vsyncadd (%p1672_p12), %s437_s27, 4294967152  ;;  %s449_s28 = scalar_lea.vmem [#allocation13], %s1735_s1 }
  0x42   : > { %1501 = dma.done.wait (%p69_p1), [#allocation15], 1024  }
  0x43   : > { %1503 = vsyncadd (%p69_p1), [#allocation15], 4294966272  ;;  %v516_v0 = vld [vmem:[%s440_s25] sm:$0xff]  ;;  %vm517_vm0 = vcmask 261120   ;;  %v605_v8 = vld [vmem:[%s430_s7 + $0x8] sm:$0xff]  ;;  %vm563_vm1 = vcmask 57344  }
  0x44   : > { %v1241_v1 = vld [vmem:[%s1889_s4] ss:$0 sm:$0xff]  ;;  %518 = vst.msk [vmem:[#allocation2] sm:$0xff] %vm517_vm0, %v516_v0  ;;  %v1763_v5 = vld [vmem:[%s430_s7] sm:$0xff]  ;;  %v620_v9 = vmul.f32 0.17677669, %v605_v8 }
  0x45   : > { %v523_v2 = vmul.f32 %v1241_v1, %v516_v0  ;;  %v619_v6 = vmul.f32 0.17677669, %v1763_v5  ;;  %v569_v7 = vld [vmem:[#allocation16 + $0x18] sm:$0xff]  ;;  %v568_v11 = vld [vmem:[#allocation16 + $0x10] sm:$0xff]  ;;  %v567_v12 = vld [vmem:[#allocation16 + $0x8] sm:$0xff]  ;;  %vm658_vm2 = vcmask 64512  }
  0x46   : > { %589 = vmatpush.msra.mxu0 %v569_v7  ;;  %v566_v13 = vld [vmem:[#allocation16] sm:$0xff]  ;;  %v1243_v14 = vld [vmem:[%s1888_s3] ss:$0 sm:$0xff]  ;;  %s1786_s5 = scalar_lea.vmem [#allocation18], %s1107_s23  ;;  %v713_v35 = vld [vmem:[#allocation14 + $0x10] sm:$0xff]  ;;  %vm599_vm3 = vcmask 0  }
  0x47   : > { %v524_v3 = vsel %vm517_vm0, %v523_v2, 0.0  ;;  %v610_v15 = vmul.f32 %v1243_v14, %v1763_v5  ;;  %v611_v17 = vmul.f32 %v1243_v14, %v605_v8  ;;  %v559_v19 = vld [vmem:[%s449_s28] sm:$0x1]  ;;  %v1540_v36 = vmov -inf   ;;  %v712_v38 = vld [vmem:[#allocation14 + $0x8] sm:$0xff]  ;;  %v711_v40 = vld [vmem:[#allocation14] sm:$0xff] }
  0x48   : > { %525 = vadd.xlane.f32.xlu0 %v524_v3  ;;  %590 = vmatpush.msra.mxu0 %v568_v11  ;;  %v1112_v20 = vadd.f32 -1.0, %v559_v19  ;;  %v1244_v31 = vld [vmem:[%s1893_s8] ss:$0 sm:$0xff]  ;;  %600 = vst.msk [vmem:[#allocation5] sm:$0x1] %vm599_vm3, %v1540_v36  ;;  %v1541_v37 = vmov 0.0  }
  0x49   : > { %v613_v16 = vsel %vm517_vm0, %v610_v15, 0.0  ;;  %v616_v18 = vsel %vm517_vm0, %v611_v17, 0.0  ;;  %v714_v34 = vld [vmem:[#allocation14 + $0x18] sm:$0xff]  ;;  %601 = vst.msk [vmem:[#allocation6] sm:$0x1] %vm599_vm3, %v1541_v37  ;;  %vm773_vm4 = vcmask 7168  }
  0x4a   : > { %591 = vmatpush.msra.mxu0 %v567_v12  ;;  %614 = vadd.xlane.f32.xlu2 %v613_v16  ;;  %v561_v21 = vmul.f32 1e+30, %v1112_v20  ;;  %s1543_s15 = smov 32   ;;  %s1544_s10 = smov 64   ;;  %vm602_vm5 = vcmask 253952   ;;  %vm839_vm6 = vcmask 523264  }
  0x4b   : > { %v621_v4 = vld [vmem:[#allocation2] sm:$0xff]  ;;  %737 = vmatpush.msra.mxu3 %v714_v34  ;;  %603 = vst.msk [vmem:[#allocation7] sm:$0x1] %vm602_vm5, %v1541_v37  ;;  %vm842_vm7 = vcmask 785408   ;;  %s1811_s21 = scalar_lea.vmem [#allocation17], %s1106_s9  ;;  %s1545_s11 = smov 96  }
  0x4c   : > { %1114 = vmatpush.xpose.msk.msra.mxu1 %vm517_vm0, %v621_v4  ;;  %592 = vmatpush.msra.mxu0 %v566_v13  ;;  %s1125_s13 = sshll.u32 %s1526_s16, 3  ;;  %s1934_s23 = sld [smem:[#allocation36_spill]] }
  0x4d   : > { %1113 = vmatmul.msk.f32.vlgmr.msra.gmra.mxu0 %vm517_vm0, %v621_v4  ;;  %738 = vmatpush.msra.mxu3 %v713_v35  ;;  %s919_s25 = sshll.u32 %s1786_s5, 4  ;;  %s890_s30 = scalar_lea.sflag [#allocation19], %s1735_s1  ;;  %s920_s25 = int_to_ptr.vmem [resolvable:$true] %s919_s25 }
  0x4f   : > { %1115 = vmatmul.msk.f32.vlgmr.msra.gmra.mxu1 %vm517_vm0, %v619_v6  ;;  %739 = vmatpush.msra.mxu3 %v712_v38  ;;  %v750_v61 = vld [vmem:[#allocation5] sm:$0x1] }
  0x50   : > { %v771_v17 = vld [vmem:[#allocation6] sm:$0x1] }
  0x51   : > { %740 = vmatpush.msra.mxu3 %v711_v40 }
  0x52   : > { %617 = vadd.xlane.f32.xlu2 %v616_v18  ;;  %1119 = vmatmul.msk.f32.vlgmr.msra.gmra.mxu3 %vm517_vm0, %v1763_v5  ;;  %s917_s27 = scalar_lea.hbm %s1934_s23, %s1125_s13  ;;  %s1432_s29 = scalar_lea.hbm %s1934_s23, 16 }
  0x53   : > { %s921_s28 = sshll.u32 %s917_s27, 4  ;;  %s922_s28 = int_to_ptr.hbm [resolvable:$true] %s921_s28 }
  0x54   : > { %s1426_s22 = sshra.s32 %s922_s28, 4  ;;  %s1427_s22 = int_to_ptr.hbm [resolvable:$true] %s1426_s22 }
  0x55   : > { %s1428_s19 = scalar_lea.hbm %s1427_s22, 8  ;;  %p1433_p6 = scmp.lt.s32.totalorder %s1427_s22, %s1934_s23 }
  0x56   : > { %p1429_p1 = scmp.ne.s32.totalorder %s1427_s22, %s1428_s19  ;;  %p1434_p8 = scmp.lt.s32.totalorder %s1432_s29, %s1428_s19 }
  0x57   : > { %1116 = vmatmul.msk.f32.gmra.mxu1 %vm517_vm0, %v620_v9 }
  0x58   : > { %p1430_p3 = pnand %p1429_p1, %p1679_p4  ;;  %p1435_p10 = por %p1434_p8, %p1433_p6 }
  0x5a   : > { %1120 = vmatmul.msk.f32.gmra.mxu3 %vm517_vm0, %v605_v8  ;;  %p1431_p5 = pneg %p1430_p3 }
  0x5c   : > { %p1436_p11 = pnand %p1435_p10, %p1431_p5 }
  0xbb   : > { %v526_v10 = vpop.xlane.xlu0 %525 }
  0xbc   : > { %527 = vxpose.xlu0.b32.start.end [1/1] (short) (narrow) %v526_v10, 8 }
  0xbd   : > { %v615_v41 = vpop.xlane.xlu2 %614 }
  0xc5   : > { %v618_v45 = vpop.xlane.xlu2 %617 }
  0xca   : > { %v594_v32 = vpop.f32.mrf.mxu0 }
  0xcb   : > { %v595_v33 = vadd.f32 %v1244_v31, %v594_v32 }
  0xcc   : > { %v652_v24 = vpop.f32.mrf.mxu1 }
  0xcd   : > { %598 = vst.msk [vmem:[#allocation3] sm:$0xff] %vm517_vm0, %v595_v33 }
  0xce   : > { %597 = vst.msk [vmem:[%s1786_s5] sm:$0xff] %vm517_vm0, %v595_v33 }
  0xd4   : > { %v655_v28 = vpop.f32.mrf.mxu1  ;;  %v677_v39 = vld [vmem:[#allocation3] sm:$0xff] }
  0xd5   : > { %699 = vmatpush.msra.mxu2 %v677_v39 }
 0x160   : > { %v543_v22 = vpop.trf.xlu0 }
 0x161   : > { %v562_v23 = vadd.f32 %v561_v21, %v543_v22  ;;  %v1542_v22 = vmov 0  }
 0x162   : > { %1238 = vset.pattern.permute.xlu1 %v1542_v22  ;;  %1239 = vset.pattern.permute.xlu2 %v1542_v22 }
 0x163   : > { %564 = vst.msk [vmem:[#allocation4] sm:$0x1] %vm563_vm1, %v562_v23  ;;  %1240 = vset.pattern.permute.xlu0 %v1542_v22 }
 0x16a   : > { %v1242_v25 = vld [vmem:[#allocation4] ss:$0 sm:$0xff] }
 0x16b   : > { %v653_v26 = vadd.f32 %v1242_v25, %v652_v24  ;;  %v656_v29 = vadd.f32 %v1242_v25, %v655_v28  ;;  %v742_v24 = vpop.f32.mrf.mxu3 }
 0x16d   : > { %v659_v27 = vsel %vm658_vm2, %v653_v26, -inf  ;;  %v662_v30 = vsel %vm658_vm2, %v656_v29, -inf }
 0x16e   : > { %660 = vmax.xlane.f32.xlu1 %v659_v27 }
 0x176   : > { %663 = vmax.xlane.f32.xlu1 %v662_v30  ;;  %v1245_v30 = vld [vmem:[%s1891_s6] ss:$0 sm:$0xff] }
 0x177   : > { %v743_v36 = vadd.f32 %v1245_v30, %v742_v24 }
 0x1e1   : > { %v661_v42 = vpop.xlane.xlu1 %660 }
 0x1e2   : > { %v665_v43 = vsub.f32 %v653_v26, %v661_v42  ;;  %v748_v47 = vadd.f32 %v661_v42, %v615_v41 }
 0x1e4   : > { %v667_v44 = vmul.f32 1.442695, %v665_v43 }
 0x1e6   : > { %1246 = vpow2.f32 %v667_v44 }
 0x1e9   : > { %v664_v46 = vpop.xlane.xlu1 %663 }
 0x1ea   : > { %v666_v48 = vsub.f32 %v656_v29, %v664_v46  ;;  %v749_v49 = vadd.f32 %v664_v46, %v618_v45  ;;  %v745_v29 = vpop.f32.mrf.mxu3 }
 0x1eb   : > { %v746_v31 = vadd.f32 %v1245_v30, %v745_v29 }
 0x1ec   : > { %v1247_v50 = vpop.eup %1246  ;;  %v669_v51 = vmul.f32 1.442695, %v666_v48  ;;  %v751_v52 = vmax.f32 %v748_v47, %v749_v49 }
 0x1ed   : > { %1117 = vmatmul.msk.f32.vlgmr.msra.gmra.mxu2 %vm658_vm2, %v1247_v50  ;;  %v671_v53 = vsel %vm658_vm2, %v1247_v50, 0.0 }
 0x1ee   : > { %1248 = vpow2.f32 %v669_v51  ;;  %v752_v54 = vrot.slane %v751_v52, 4  ;;  %672 = vadd.xlane.f32.xlu1 %v671_v53 }
 0x1f0   : > { %v753_v55 = vmax.f32 %v751_v52, %v752_v54 }
 0x1f2   : > { %v754_v56 = vrot.slane %v753_v55, 2 }
 0x1f4   : > { %v1249_v57 = vpop.eup %1248  ;;  %v755_v58 = vmax.f32 %v753_v55, %v754_v56 }
 0x1f5   : > { %1118 = vmatmul.msk.f32.gmra.mxu2 %vm658_vm2, %v1249_v57  ;;  %v674_v59 = vsel %vm658_vm2, %v1249_v57, 0.0 }
 0x1f6   : > { %v756_v60 = vrot.slane %v755_v58, 1  ;;  %675 = vadd.xlane.f32.xlu2 %v674_v59 }
 0x1f8   : > { %v757_v62 = vmax.f32 %v755_v58, %v756_v60 }
 0x1fa   : > { %v758_v63 = vmax.f32 %v750_v61, %v757_v62 }
 0x1fc   : > { %v763_v0 = vperm.slane %v758_v63, 0  ;;  %818 = vst.msk [vmem:[#allocation5] sm:$0x1] %vm599_vm3, %v758_v63  ;;  %v759_v5 = vsub.f32 %v750_v61, %v758_v63  ;;  %v786_v63 = vld [vmem:[#allocation7] sm:$0x1] }
 0x1fe   : > { %v765_v1 = vsub.f32 %v748_v47, %v763_v0  ;;  %v766_v2 = vsub.f32 %v749_v49, %v763_v0  ;;  %v760_v9 = vmul.f32 1.442695, %v759_v5 }
 0x200   : > { %v767_v3 = vmul.f32 1.442695, %v765_v1  ;;  %v769_v4 = vmul.f32 1.442695, %v766_v2 }
 0x202   : > { %1250 = vpow2.f32 %v767_v3 }
 0x203   : > { %1252 = vpow2.f32 %v769_v4 }
 0x204   : > { %1254 = vpow2.f32 %v760_v9 }
 0x208   : > { %v1251_v6 = vpop.eup %1250 }
 0x209   : > { %v1253_v7 = vpop.eup %1252  ;;  %v774_v8 = vsel %vm773_vm4, %v1251_v6, 0.0 }
 0x20a   : > { %v775_v10 = vsel %vm773_vm4, %v1253_v7, 0.0  ;;  %v1255_v16 = vpop.eup %1254 }
 0x20b   : > { %v776_v11 = vadd.f32 %v775_v10, %v774_v8  ;;  %v772_v20 = vmul.f32 %v1255_v16, %v771_v17 }
 0x20d   : > { %v777_v12 = vrot.slane %v776_v11, 4 }
 0x20f   : > { %v778_v13 = vadd.f32 %v777_v12, %v776_v11 }
 0x211   : > { %v779_v14 = vrot.slane %v778_v13, 2 }
 0x213   : > { %v780_v15 = vadd.f32 %v779_v14, %v778_v13 }
 0x215   : > { %v781_v18 = vrot.slane %v780_v15, 1 }
 0x217   : > { %v782_v19 = vadd.f32 %v781_v18, %v780_v15 }
 0x219   : > { %v783_v21 = vadd.f32 %v782_v19, %v772_v20 }
 0x21b   : > { %785 = vst.msk [vmem:[#allocation6] sm:$0x1] %vm599_vm3, %v783_v21 }
 0x222   : > { %v849_v39 = vld [vmem:[#allocation6] sm:$0x1] }
 0x261   : > { %v673_v23 = vpop.xlane.xlu1 %672 }
 0x262   : > { %1256 = vrcp.f32 %v673_v23 }
 0x268   : > { %v1257_v26 = vpop.eup %1256 }
 0x269   : > { %v676_v25 = vpop.xlane.xlu2 %675 }
 0x26a   : > { %1258 = vrcp.f32 %v676_v25 }
 0x26b   : > { %1260 = vrcp.f32 %v849_v39 }
 0x270   : > { %v701_v27 = vpop.f32.mrf.mxu2  ;;  %v1259_v32 = vpop.eup %1258 }
 0x271   : > { %v709_v28 = vmul.f32 %v1257_v26, %v701_v27  ;;  %v1261_v40 = vpop.eup %1260 }
 0x273   : > { %823 = vrot.lane.b32.xlu1 %v709_v28, %s1543_s15  ;;  %v819_v38 = vmul.f32 %v743_v36, %v709_v28 }
 0x278   : > { %v704_v33 = vpop.f32.mrf.mxu2 }
 0x279   : > { %v710_v34 = vmul.f32 %v1259_v32, %v704_v33 }
 0x27b   : > { %796 = vperm.xlu1 %1238, %v1251_v6   ;;  %825 = vrot.lane.b32.xlu2 %v710_v34, %s1543_s15  ;;  %v820_v35 = vmul.f32 %v746_v31, %v710_v34 }
 0x27d   : > { %833 = vrot.lane.b32.xlu0 %v820_v35, %s1544_s10 }
 0x283   : > { %789 = vperm.xlu1 %1238, %v1255_v16   ;;  %831 = vrot.lane.b32.xlu2 %v819_v38, %s1544_s10 }
 0x28b   : > { %801 = vperm.xlu2 %1239, %v1253_v7  }
 0x293   : > { %853 = vperm.xlu2 %1239, %v1261_v40  }
 0x2d5   : > { %v826_v41 = vpop.permute.xlu2 %825 }
 0x2d6   : > { %v838_v49 = vsel %vm517_vm0, %v746_v31, %v826_v41 }
 0x2dd   : > { %v832_v42 = vpop.permute.xlu2 %831 }
 0x2e5   : > { %v824_v43 = vpop.permute.xlu1 %823  ;;  %v802_v46 = vpop.permute.xlu2 %801 }
 0x2e6   : > { %v837_v44 = vsel %vm517_vm0, %v743_v36, %v824_v43  ;;  %v805_v47 = vmul.f32 %v802_v46, %v746_v31 }
 0x2e7   : > { %v840_v45 = vsel %vm839_vm6, %v837_v44, %v832_v42 }
 0x2e8   : > { %843 = vst.msk [vmem:[%s1811_s21] sm:$0xff] %vm842_vm7, %v840_v45  ;;  %v807_v52 = vsel %vm517_vm0, %v805_v47, 0.0 }
 0x2ed   : > { %v797_v37 = vpop.permute.xlu1 %796  ;;  %v854_v4 = vpop.permute.xlu2 %853 }
 0x2ee   : > { %v804_v48 = vmul.f32 %v797_v37, %v743_v36  ;;  %v856_v6 = vperm.slane %v854_v4, 0 }
 0x2ef   : > { %v834_v50 = vpop.permute.xlu0 %833  ;;  %v858_v51 = vld [vmem:[%s1811_s21] sm:$0xff] }
 0x2f0   : > { %v806_v53 = vsel %vm517_vm0, %v804_v48, 0.0  ;;  %v841_v54 = vsel %vm839_vm6, %v838_v49, %v834_v50  ;;  %865 = vrot.lane.b32.xlu1 %v858_v51, %s1545_s11 }
 0x2f1   : > { %v808_v55 = vadd.f32 %v807_v52, %v806_v53  ;;  %844 = vst.msk [vmem:[%s1811_s21 + $0x8] sm:$0xff] %vm842_vm7, %v841_v54 }
 0x2f3   : > { %v809_v56 = vrot.slane %v808_v55, 4 }
 0x2f5   : > { %v810_v57 = vadd.f32 %v809_v56, %v808_v55  ;;  %v790_v58 = vpop.permute.xlu1 %789 }
 0x2f6   : > { %v792_v62 = vperm.slane %v790_v58, 0 }
 0x2f7   : > { %v811_v59 = vrot.slane %v810_v57, 2 }
 0x2f8   : > { %v859_v60 = vld [vmem:[%s1811_s21 + $0x8] sm:$0xff]  ;;  %v793_v1 = vmul.f32 %v792_v62, %v786_v63 }
 0x2f9   : > { %v812_v61 = vadd.f32 %v811_v59, %v810_v57  ;;  %867 = vrot.lane.b32.xlu2 %v859_v60, %s1545_s11 }
 0x2fb   : > { %v813_v0 = vrot.slane %v812_v61, 1 }
 0x2fd   : > { %v814_v2 = vadd.f32 %v813_v0, %v812_v61 }
 0x2ff   : > { %v815_v3 = vadd.f32 %v814_v2, %v793_v1 }
 0x301   : > { %817 = vst.msk [vmem:[#allocation7] sm:$0x1] %vm602_vm5, %v815_v3 }
 0x308   : > { %v848_v5 = vld [vmem:[#allocation7] sm:$0x1] }
 0x309   : > { %v857_v7 = vmul.f32 %v856_v6, %v848_v5 }
 0x30b   : > { %v861_v8 = vperm.slane %v857_v7, 0 }
 0x353   : > { %v868_v9 = vpop.permute.xlu2 %867 }
 0x354   : > { %v872_v10 = vmul.f32 %v868_v9, %v861_v8 }
 0x356   : > { %877 = vrot.lane.b32.xlu2 %v872_v10, %s1545_s11 }
 0x357   : > { %1439 = shalt.err (!%p1436_p11)
}
 0x358   : > { %1145 = dma.vmem_to_hbm [thread:$0]  (%p1679_p4), %s920_s25, 128, %s922_s28, %s890_s30   ;;  %vm881_vm8 = vcmask 1048320  }
 0x359   : > { %s1129_s5 = sshll.u32 %s1526_s16, 4  ;;  %s1935_s13 = sld [smem:[#allocation35_spill]] }
 0x35a   : > { %s902_s27 = sshll.u32 %s1811_s21, 4  ;;  %s885_s25 = scalar_lea.sflag [#allocation10], %s1735_s1  ;;  %s903_s27 = int_to_ptr.vmem [resolvable:$true] %s902_s27 }
 0x35f   : > { %s1936_s7 = smov %s1935_s13  ;;  %s901_s18 = scalar_lea.hbm %s1935_s13, %s1129_s5 }
 0x360   : > { %s904_s22 = sshll.u32 %s901_s18, 4  ;;  %s1460_s19 = scalar_lea.hbm %s1936_s7, 32  ;;  %s905_s22 = int_to_ptr.hbm [resolvable:$true] %s904_s22 }
 0x361   : > { %s1454_s28 = sshra.s32 %s905_s22, 4  ;;  %s1455_s28 = int_to_ptr.hbm [resolvable:$true] %s1454_s28 }
 0x362   : > { %v866_v11 = vpop.permute.xlu1 %865  ;;  %s1456_s30 = scalar_lea.hbm %s1455_s28, 16  ;;  %p1461_p2 = scmp.lt.s32.totalorder %s1455_s28, %s1936_s7 }
 0x363   : > { %v871_v12 = vmul.f32 %v866_v11, %v861_v8  ;;  %p1457_p12 = scmp.ne.s32.totalorder %s1455_s28, %s1456_s30  ;;  %p1462_p9 = scmp.lt.s32.totalorder %s1460_s19, %s1456_s30 }
 0x365   : > { %875 = vrot.lane.b32.xlu1 %v871_v12, %s1545_s11  ;;  %p1458_p13 = pnand %p1457_p12, %p1679_p4  ;;  %p1463_p1 = por %p1462_p9, %p1461_p2 }
 0x367   : > { %p1459_p0 = pneg %p1458_p13 }
 0x369   : > { %p1464_p3 = pnand %p1463_p1, %p1459_p0 }
 0x3b0   : > { %v878_v13 = vpop.permute.xlu2 %877 }
 0x3b1   : > { %883 = vst.msk [vmem:[%s1811_s21 + $0x8] sm:$0xff] %vm881_vm8, %v878_v13 }
 0x3d7   : > { %v876_v14 = vpop.permute.xlu1 %875 }
 0x3d8   : > { %882 = vst.msk [vmem:[%s1811_s21] sm:$0xff] %vm881_vm8, %v876_v14 }
 0x3d9   : > { %1467 = shalt.err (!%p1464_p3)
}
 0x3da   : > { %s1546_s1 = smov 128   ;;  %s1547_s21 = smov 8  }
 0x3db   : > { %1144 = dma.vmem_to_hbm [thread:$0]  (%p1679_p4), %s903_s27, 256, %s905_s22, %s885_s25, %s1546_s1, %s1546_s1, %s1547_s21  }
 0x3dc PF: > { %s1937_s29 = sld [smem:[#allocation25_spill]] }
 0x3dd   : > { %s1939_s20 = sld [smem:[#allocation27_spill]] }
 0x3e2   : > { %s933_s5 = sand.u32 1, %s1937_s29  }
 0x3e3   : > { %p1940_p5 = scmp.ge.s32.totalorder %s1939_s20, 2  ;;  %s934_s26 = scalar_lea.sflag [#allocation10], %s933_s5 }
 0x3e5   : > { %p1166_p6 = pnand %p1940_p5, %p1687_p7 }
 0x3e7   : > { %p1167_p8 = pneg %p1166_p6 }
 0x3e9   : > { %1505 = dma.done.wait (%p1167_p8), %s934_s26, 256  }
 0x3ea   : > { %1507 = vsyncadd (%p1167_p8), %s934_s26, 4294967040  ;;  %s944_s10 = scalar_lea.sflag [#allocation19], %s933_s5 }
 0x3eb   : > { %1509 = dma.done.wait (%p1167_p8), %s944_s10, 128  }
 0x3ec   : > { %1511 = vsyncadd (%p1167_p8), %s944_s10, 4294967168  ;;  %s34_s18 = sadd.s32 1, %s1939_s20   ;;  %s1941_s9 = sld [smem:[#allocation26_spill]] }
 0x3ed   : > { %p31_p10 = scmp.ge.s32.totalorder %s34_s18, 4   ;;  %s1942_s15 = sld [smem:[#allocation30_spill]] }
 0x3ee   : > { %s1943_s27 = sld [smem:[#allocation28_spill]]  ;;  %s1944_s13 = smov %s1518_s14 }
 0x3ef   : > { %s1946_s16 = smov %s1530_s17 }
 0x3f0   :  { %33 = sbr.rel (!%p31_p10) target bundleno = 17 (0x11), region = 158 }
 0x3f2   : > { %s1945_s14 = smov %s1941_s9 }
 0x3f4   : > { %s1947_s17 = smov %s1943_s27 }
 0x3f5   :  { %950 = vsyncpa [#allocation9], 1 }
 0x3f6   :  { %952 = vsyncpa [#allocation9 + $0x1], 1 }
 0x3f7   :  { %953 = vsyncpa [#allocation12], 1 }
 0x3f8   :  { %955 = vsyncpa [#allocation12 + $0x1], 1 }
 0x3f9   :  { %956 = vsyncpa [#allocation15], 1 }
 0x3fa   :  { %957 = vsyncpa [#allocation10], 1 }
 0x3fb   :  { %959 = vsyncpa [#allocation10 + $0x1], 1 }
 0x3fc   :  { %960 = vsyncpa [#allocation19], 1 }
 0x3fd   :  { %962 = vsyncpa [#allocation19 + $0x1], 1 }

// kernel: tpu_custom_call.1
= control target key start
LH: loop header
LB: loop body
LE: loop exit
PB: predicated region body
PF: predicated region fallthrough
CT: control target
= control target key end

     0   :  { %s1885_s0 = inlined_call_operand.hbm [shape: f32[2,16,32], index: 0, kind: input, shape index: {}]   ;;  %s1886_s1 = inlined_call_operand.hbm [shape: f32[2,8,32], index: 1, kind: input, shape index: {}]   ;;  %s1887_s2 = inlined_call_operand.hbm [shape: f32[2,1,8], index: 2, kind: input, shape index: {}]   ;;  %s1888_s3 = inlined_call_operand.vmem [shape: f32[1,32], index: 3, kind: input, shape index: {}]   ;;  %s1889_s4 = inlined_call_operand.vmem [shape: f32[1,32], index: 4, kind: input, shape index: {}]   ;;  %s1890_s5 = inlined_call_operand.hbm [shape: f32[32,32], index: 5, kind: input, shape index: {}]   ;;  %s1891_s6 = inlined_call_operand.vmem [shape: f32[1,32], index: 6, kind: input, shape index: {}]   ;;  %s1892_s7 = inlined_call_operand.hbm [shape: f32[32,32], index: 7, kind: input, shape index: {}]   ;;  %s1893_s8 = inlined_call_operand.vmem [shape: f32[1,32], index: 8, kind: input, shape index: {}]   ;;  %s1894_s9 = inlined_call_operand.hbm [shape: f32[2,16,128], index: 9, kind: output, shape index: {0}]   ;;  %s1895_s10 = inlined_call_operand.hbm [shape: f32[2,8,32], index: 10, kind: output, shape index: {1}]  }
   0x1   :  { %1910 = sst [smem:[#allocation32_spill]] %s1886_s1 }
   0x2   :  { %1911 = sst [smem:[#allocation33_spill]] %s1890_s5 }
   0x3   :  { %1912 = sst [smem:[#allocation34_spill]] %s1892_s7 }
   0x4   :  { %1913 = sst [smem:[#allocation35_spill]] %s1894_s9 }
   0x5   :  { %1914 = sst [smem:[#allocation36_spill]] %s1895_s10 }
   0x6   :  { %16 = vsyncpa [#allocation9], 0 }
   0x7   :  { %18 = vsyncpa [#allocation9 + $0x1], 0 }
   0x8   :  { %19 = vsyncpa [#allocation12], 0 }
   0x9   :  { %21 = vsyncpa [#allocation12 + $0x1], 0 }
   0xa   :  { %22 = vsyncpa [#allocation15], 0 }
   0xb   :  { %23 = vsyncpa [#allocation10], 0 }
   0xc   :  { %25 = vsyncpa [#allocation10 + $0x1], 0 }
   0xd   :  { %26 = vsyncpa [#allocation19], 0 }
   0xe   :  { %28 = vsyncpa [#allocation19 + $0x1], 0  ;;  %s1603_s13 = smov 0   ;;  %s1605_s14 = smov 0  }
   0xf   :  { %s1607_s15 = smov 0   ;;  %s1609_s16 = smov 0  }
  0x10   :  { %s1611_s17 = smov 0   ;;  %s1613_s18 = smov 0  }
  0x11 LB: > { %1915 = sst [smem:[#allocation25_spill]] %s1514_s13  ;;  %s1634_s19 = sadd.s32 4294967295, %s1534_s18   ;;  %s1534_s18 = sphi %s1613_s18, %s34_s18   ;;  %s1530_s17 = sphi %s1611_s17, %s1947_s17   ;;  %s1526_s16 = sphi %s1609_s16, %s1946_s16   ;;  %s1522_s15 = sphi %s1607_s15, %s1942_s15   ;;  %s1518_s14 = sphi %s1605_s14, %s1945_s14   ;;  %s1514_s13 = sphi %s1603_s13, %s1944_s13  }
  0x12   : > { %1916 = sst [smem:[#allocation26_spill]] %s1522_s15  ;;  %p1096_p0 = scmp.ge.s32.totalorder %s1534_s18, 1 }
  0x13   : > { %1917 = sst [smem:[#allocation27_spill]] %s1534_s18  ;;  %p69_p1 = scmp.eq.s32.totalorder %s1634_s19, 0 }
  0x14   : > { %p309_p2 = scmp.lt.s32.totalorder %s1534_s18, 3  ;;  %s1918_s5 = sld [smem:[#allocation33_spill]] }
  0x15   : > { %s1536_s24 = smov [#allocation14]   ;;  %s1896_s27 = smov 128  }
  0x16   : > { %p1642_p3 = pnand %p1096_p0, %p309_p2  ;;  %s328_s25 = sshll.u32 %s1536_s24, 4  ;;  %s329_s25 = int_to_ptr.vmem [resolvable:$true] %s328_s25 }
  0x17   : > { %s1898_s28 = smov 8   ;;  %s1095_s29 = sadd.s32 4294967294, %s1534_s18  }
  0x18   : > { %p1148_p4 = pneg %p1642_p3  ;;  %s46_s30 = sadd.s32 1, %s1530_s17 }
  0x19   : > { %s55_s11 = sadd.s32 1, %s1522_s15  ;;  %p48_p7 = scmp.ge.s32.totalorder %s46_s30, 2 }
  0x1a   : > { %s326_s22 = sshll.u32 %s1918_s5, 4  ;;  %p1650_p5 = pnand %p1148_p4, %p69_p1  ;;  %s327_s22 = int_to_ptr.hbm [resolvable:$true] %s326_s22 }
  0x1b   : > { %p62_p8 = scmp.ne.s32.totalorder %s1522_s15, %s1518_s14  ;;  %p63_p9 = scmp.eq.s32.totalorder %s1534_s18, 0 }
  0x1c   : > { %1151 = dma.hbm_to_vmem [thread:$0]  (!%p1650_p5), %s327_s22, 512, %s329_s25, [#allocation15], %s1896_s27, %s1896_s27, %s1898_s28  }
  0x1d   : > { %p68_p10 = scmp.ne.s32.totalorder %s1518_s14, %s1514_s13  ;;  %s1949_s30 = smov (%p48_p7, %s46_s30), 0 }
  0x1e   : > { %1921 = sst [smem:[#allocation28_spill]] %s1949_s30  ;;  %p64_p11 = por %p63_p9, %p62_p8 }
  0x1f   : > { %p1672_p12 = por %p69_p1, %p68_p10  ;;  %s50_s20 = ssub.s32 %s1530_s17, %s1949_s30 }
  0x20   : > { %p270_p13 = scmp.eq.s32.totalorder %s1634_s19, 1  ;;  %p53_p0 = scmp.eq.s32.totalorder %s50_s20, 0 }
  0x21   : > { %p276_p2 = scmp.eq.s32.totalorder %s1095_s29, 1  ;;  %p1174_p6 = scmp.lt.s32.totalorder %s1534_s18, 2 }
  0x22   : > { %p1679_p4 = por %p270_p13, %p62_p8  ;;  %s1692_s25 = sand.u32 1, %s1522_s15  }
  0x23   : > { %s1685_s22 = scalar_select %p53_p0, %s1522_s15, %s55_s11  }
  0x24   : > { %s1923_s21 = scalar_select %p1679_p4, 1, 0 }
  0x25   : > { %1925 = sst [smem:[#allocation30_spill]] %s1685_s22  ;;  %p1687_p7 = por %p276_p2, %p68_p10 }
  0x26   : > { %1924 = sst [smem:[#allocation29_spill]] %s1923_s21  ;;  %p1694_p9 = pnand %p1174_p6, %p64_p11 }
  0x27   : > { %s1926_s24 = scalar_select %p1687_p7, 1, 0 }
  0x28   : > { %s386_s29 = sand.u32 1, %s1534_s18   ;;  %s1103_s20 = sshll.u32 %s1692_s25, 3 }
  0x29   : > { %1927 = sst [smem:[#allocation31_spill]] %s1926_s24  ;;  %s1104_s28 = sshll.u32 %s1530_s17, 3 }
  0x2a   : > { %s390_s11 = scalar_lea.vmem [#allocation11], %s1103_s20  ;;  %s1929_s1 = sld [smem:[#allocation32_spill]] }
  0x2b   : > { %s398_s5 = sshll.u32 %s390_s11, 4  ;;  %s1930_s7 = sld [smem:[#allocation34_spill]]  ;;  %s399_s5 = int_to_ptr.vmem [resolvable:$true] %s398_s5 }
  0x2c   : > { %s387_s18 = scalar_lea.sflag [#allocation12], %s386_s29  ;;  %s1539_s20 = smov [#allocation16]  }
  0x2d   : > { %s345_s11 = sshll.u32 %s1539_s20, 4  ;;  %s1100_s21 = sshll.u32 %s1692_s25, 4  ;;  %s346_s11 = int_to_ptr.vmem [resolvable:$true] %s345_s11 }
  0x2e   : > { %s1932_s30 = smov 128   ;;  %s1128_s9 = sshll.u32 %s1530_s17, 4 }
  0x2f   : > { %s366_s13 = scalar_lea.vmem [#allocation8], %s1100_s21  ;;  %s373_s29 = scalar_lea.hbm %s1885_s0, %s1128_s9 }
  0x30   : > { %s394_s24 = scalar_lea.hbm %s1929_s1, %s1104_s28  ;;  %s1931_s28 = smov 8  }
  0x31   : > { %s396_s15 = sshll.u32 %s394_s24, 4  ;;  %s343_s10 = sshll.u32 %s1930_s7, 4  ;;  %s397_s15 = int_to_ptr.hbm [resolvable:$true] %s396_s15  ;;  %s344_s10 = int_to_ptr.hbm [resolvable:$true] %s343_s10 }
  0x32   : > { %1161 = dma.hbm_to_vmem [thread:$0]  (!%p1694_p9), %s397_s15, 128, %s399_s5, %s387_s18  }
  0x33   : > { %1154 = dma.hbm_to_vmem [thread:$0]  (!%p1650_p5), %s344_s10, 512, %s346_s11, [#allocation15], %s1932_s30, %s1932_s30, %s1931_s28  }
  0x34   : > { %s376_s22 = sshll.u32 %s366_s13, 4  ;;  %s374_s5 = sshll.u32 %s373_s29, 4  ;;  %s377_s22 = int_to_ptr.vmem [resolvable:$true] %s376_s22  ;;  %s375_s5 = int_to_ptr.hbm [resolvable:$true] %s374_s5 }
  0x35   : > { %s411_s7 = scalar_lea.hbm %s1887_s2, %s1530_s17  ;;  %s363_s26 = scalar_lea.sflag [#allocation9], %s1692_s25 }
  0x36   : > { %1158 = dma.hbm_to_vmem [thread:$0]  (!%p1694_p9), %s375_s5, 256, %s377_s22, %s363_s26, %s1932_s30, %s1932_s30, %s1931_s28  }
  0x37   : > { %s413_s10 = sshll.u32 %s411_s7, 4  ;;  %s408_s21 = scalar_lea.vmem [#allocation13], %s1692_s25  ;;  %s414_s10 = int_to_ptr.hbm [resolvable:$true] %s413_s10 }
  0x38   : > { %s415_s11 = sshll.u32 %s408_s21, 4  ;;  %424 = sbr.rel (%p1642_p3) target bundleno = 988 (0x3dc), region = 56  ;;  %s416_s11 = int_to_ptr.vmem [resolvable:$true] %s415_s11 }
  0x39   : > { %1164 = dma.hbm_to_vmem [thread:$0]  (!%p1694_p9), %s414_s10, 16, %s416_s11, %s387_s18  }
  0x3a   : > { %s1735_s1 = sand.u32 (!%p1642_p3), 1, %s1518_s14  }
  0x3b   : > { %s1106_s9 = sshll.u32 (!%p1642_p3), %s1735_s1, 4  ;;  %s427_s13 = scalar_lea.sflag (!%p1642_p3), [#allocation9], %s1735_s1 }
  0x3c   : > { %s430_s7 = scalar_lea.vmem (!%p1642_p3), [#allocation8], %s1106_s9 }
  0x3d   : > { %1493 = dma.done.wait (%p1672_p12), %s427_s13, 256  }
  0x3e   : > { %1495 = vsyncadd (%p1672_p12), %s427_s13, 4294967040  ;;  %s436_s18 = sand.u32 1, %s1634_s19   ;;  %s1107_s23 = sshll.u32 %s1735_s1, 3 }
  0x3f   : > { %s437_s27 = scalar_lea.sflag [#allocation12], %s436_s18  ;;  %s440_s25 = scalar_lea.vmem [#allocation11], %s1107_s23 }
  0x40   : > { %1497 = dma.done.wait (%p1672_p12), %s437_s27, 144  }
  0x41   : > { %1499 = vsyncadd (%p1672_p12), %s437_s27, 4294967152  ;;  %s449_s28 = scalar_lea.vmem [#allocation13], %s1735_s1 }
  0x42   : > { %1501 = dma.done.wait (%p69_p1), [#allocation15], 1024  }
  0x43   : > { %1503 = vsyncadd (%p69_p1), [#allocation15], 4294966272  ;;  %v516_v0 = vld [vmem:[%s440_s25] sm:$0xff]  ;;  %vm517_vm0 = vcmask 261120   ;;  %v605_v8 = vld [vmem:[%s430_s7 + $0x8] sm:$0xff]  ;;  %vm563_vm1 = vcmask 57344  }
  0x44   : > { %v1241_v1 = vld [vmem:[%s1889_s4] ss:$0 sm:$0xff]  ;;  %518 = vst.msk [vmem:[#allocation2] sm:$0xff] %vm517_vm0, %v516_v0  ;;  %v1763_v5 = vld [vmem:[%s430_s7] sm:$0xff]  ;;  %v620_v9 = vmul.f32 0.17677669, %v605_v8 }
  0x45   : > { %v523_v2 = vmul.f32 %v1241_v1, %v516_v0  ;;  %v619_v6 = vmul.f32 0.17677669, %v1763_v5  ;;  %v569_v7 = vld [vmem:[#allocation16 + $0x18] sm:$0xff]  ;;  %v568_v11 = vld [vmem:[#allocation16 + $0x10] sm:$0xff]  ;;  %v567_v12 = vld [vmem:[#allocation16 + $0x8] sm:$0xff]  ;;  %vm658_vm2 = vcmask 64512  }
  0x46   : > { %589 = vmatpush.msra.mxu0 %v569_v7  ;;  %v566_v13 = vld [vmem:[#allocation16] sm:$0xff]  ;;  %v1243_v14 = vld [vmem:[%s1888_s3] ss:$0 sm:$0xff]  ;;  %s1786_s5 = scalar_lea.vmem [#allocation18], %s1107_s23  ;;  %v713_v35 = vld [vmem:[#allocation14 + $0x10] sm:$0xff]  ;;  %vm599_vm3 = vcmask 0  }
  0x47   : > { %v524_v3 = vsel %vm517_vm0, %v523_v2, 0.0  ;;  %v610_v15 = vmul.f32 %v1243_v14, %v1763_v5  ;;  %v611_v17 = vmul.f32 %v1243_v14, %v605_v8  ;;  %v559_v19 = vld [vmem:[%s449_s28] sm:$0x1]  ;;  %v1540_v36 = vmov -inf   ;;  %v712_v38 = vld [vmem:[#allocation14 + $0x8] sm:$0xff]  ;;  %v711_v40 = vld [vmem:[#allocation14] sm:$0xff] }
  0x48   : > { %525 = vadd.xlane.f32.xlu0 %v524_v3  ;;  %590 = vmatpush.msra.mxu0 %v568_v11  ;;  %v1112_v20 = vadd.f32 -1.0, %v559_v19  ;;  %v1244_v31 = vld [vmem:[%s1893_s8] ss:$0 sm:$0xff]  ;;  %600 = vst.msk [vmem:[#allocation5] sm:$0x1] %vm599_vm3, %v1540_v36  ;;  %v1541_v37 = vmov 0.0  }
  0x49   : > { %v613_v16 = vsel %vm517_vm0, %v610_v15, 0.0  ;;  %v616_v18 = vsel %vm517_vm0, %v611_v17, 0.0  ;;  %v714_v34 = vld [vmem:[#allocation14 + $0x18] sm:$0xff]  ;;  %601 = vst.msk [vmem:[#allocation6] sm:$0x1] %vm599_vm3, %v1541_v37  ;;  %vm773_vm4 = vcmask 7168  }
  0x4a   : > { %591 = vmatpush.msra.mxu0 %v567_v12  ;;  %614 = vadd.xlane.f32.xlu2 %v613_v16  ;;  %v561_v21 = vmul.f32 1e+30, %v1112_v20  ;;  %s1543_s15 = smov 32   ;;  %s1544_s10 = smov 64   ;;  %vm602_vm5 = vcmask 253952   ;;  %vm839_vm6 = vcmask 523264  }
  0x4b   : > { %v621_v4 = vld [vmem:[#allocation2] sm:$0xff]  ;;  %737 = vmatpush.msra.mxu3 %v714_v34  ;;  %603 = vst.msk [vmem:[#allocation7] sm:$0x1] %vm602_vm5, %v1541_v37  ;;  %vm842_vm7 = vcmask 785408   ;;  %s1811_s21 = scalar_lea.vmem [#allocation17], %s1106_s9  ;;  %s1545_s11 = smov 96  }
  0x4c   : > { %1114 = vmatpush.xpose.msk.msra.mxu1 %vm517_vm0, %v621_v4  ;;  %592 = vmatpush.msra.mxu0 %v566_v13  ;;  %s1125_s13 = sshll.u32 %s1526_s16, 3  ;;  %s1934_s23 = sld [smem:[#allocation36_spill]] }
  0x4d   : > { %1113 = vmatmul.msk.f32.vlgmr.msra.gmra.mxu0 %vm517_vm0, %v621_v4  ;;  %738 = vmatpush.msra.mxu3 %v713_v35  ;;  %s919_s25 = sshll.u32 %s1786_s5, 4  ;;  %s890_s30 = scalar_lea.sflag [#allocation19], %s1735_s1  ;;  %s920_s25 = int_to_ptr.vmem [resolvable:$true] %s919_s25 }
  0x4f   : > { %1115 = vmatmul.msk.f32.vlgmr.msra.gmra.mxu1 %vm517_vm0, %v619_v6  ;;  %739 = vmatpush.msra.mxu3 %v712_v38  ;;  %v750_v61 = vld [vmem:[#allocation5] sm:$0x1] }
  0x50   : > { %v771_v17 = vld [vmem:[#allocation6] sm:$0x1] }
  0x51   : > { %740 = vmatpush.msra.mxu3 %v711_v40 }
  0x52   : > { %617 = vadd.xlane.f32.xlu2 %v616_v18  ;;  %1119 = vmatmul.msk.f32.vlgmr.msra.gmra.mxu3 %vm517_vm0, %v1763_v5  ;;  %s917_s27 = scalar_lea.hbm %s1934_s23, %s1125_s13  ;;  %s1432_s29 = scalar_lea.hbm %s1934_s23, 16 }
  0x53   : > { %s921_s28 = sshll.u32 %s917_s27, 4  ;;  %s922_s28 = int_to_ptr.hbm [resolvable:$true] %s921_s28 }
  0x54   : > { %s1426_s22 = sshra.s32 %s922_s28, 4  ;;  %s1427_s22 = int_to_ptr.hbm [resolvable:$true] %s1426_s22 }
  0x55   : > { %s1428_s19 = scalar_lea.hbm %s1427_s22, 8  ;;  %p1433_p6 = scmp.lt.s32.totalorder %s1427_s22, %s1934_s23 }
  0x56   : > { %p1429_p1 = scmp.ne.s32.totalorder %s1427_s22, %s1428_s19  ;;  %p1434_p8 = scmp.lt.s32.totalorder %s1432_s29, %s1428_s19 }
  0x57   : > { %1116 = vmatmul.msk.f32.gmra.mxu1 %vm517_vm0, %v620_v9 }
  0x58   : > { %p1430_p3 = pnand %p1429_p1, %p1679_p4  ;;  %p1435_p10 = por %p1434_p8, %p1433_p6 }
  0x5a   : > { %1120 = vmatmul.msk.f32.gmra.mxu3 %vm517_vm0, %v605_v8  ;;  %p1431_p5 = pneg %p1430_p3 }
  0x5c   : > { %p1436_p11 = pnand %p1435_p10, %p1431_p5 }
  0xbb   : > { %v526_v10 = vpop.xlane.xlu0 %525 }
  0xbc   : > { %527 = vxpose.xlu0.b32.start.end [1/1] (short) (narrow) %v526_v10, 8 }
  0xbd   : > { %v615_v41 = vpop.xlane.xlu2 %614 }
  0xc5   : > { %v618_v45 = vpop.xlane.xlu2 %617 }
  0xca   : > { %v594_v32 = vpop.f32.mrf.mxu0 }
  0xcb   : > { %v595_v33 = vadd.f32 %v1244_v31, %v594_v32 }
  0xcc   : > { %v652_v24 = vpop.f32.mrf.mxu1 }
  0xcd   : > { %598 = vst.msk [vmem:[#allocation3] sm:$0xff] %vm517_vm0, %v595_v33 }
  0xce   : > { %597 = vst.msk [vmem:[%s1786_s5] sm:$0xff] %vm517_vm0, %v595_v33 }
  0xd4   : > { %v655_v28 = vpop.f32.mrf.mxu1  ;;  %v677_v39 = vld [vmem:[#allocation3] sm:$0xff] }
  0xd5   : > { %699 = vmatpush.msra.mxu2 %v677_v39 }
 0x160   : > { %v543_v22 = vpop.trf.xlu0 }
 0x161   : > { %v562_v23 = vadd.f32 %v561_v21, %v543_v22  ;;  %v1542_v22 = vmov 0  }
 0x162   : > { %1238 = vset.pattern.permute.xlu1 %v1542_v22  ;;  %1239 = vset.pattern.permute.xlu2 %v1542_v22 }
 0x163   : > { %564 = vst.msk [vmem:[#allocation4] sm:$0x1] %vm563_vm1, %v562_v23  ;;  %1240 = vset.pattern.permute.xlu0 %v1542_v22 }
 0x16a   : > { %v1242_v25 = vld [vmem:[#allocation4] ss:$0 sm:$0xff] }
 0x16b   : > { %v653_v26 = vadd.f32 %v1242_v25, %v652_v24  ;;  %v656_v29 = vadd.f32 %v1242_v25, %v655_v28  ;;  %v742_v24 = vpop.f32.mrf.mxu3 }
 0x16d   : > { %v659_v27 = vsel %vm658_vm2, %v653_v26, -inf  ;;  %v662_v30 = vsel %vm658_vm2, %v656_v29, -inf }
 0x16e   : > { %660 = vmax.xlane.f32.xlu1 %v659_v27 }
 0x176   : > { %663 = vmax.xlane.f32.xlu1 %v662_v30  ;;  %v1245_v30 = vld [vmem:[%s1891_s6] ss:$0 sm:$0xff] }
 0x177   : > { %v743_v36 = vadd.f32 %v1245_v30, %v742_v24 }
 0x1e1   : > { %v661_v42 = vpop.xlane.xlu1 %660 }
 0x1e2   : > { %v665_v43 = vsub.f32 %v653_v26, %v661_v42  ;;  %v748_v47 = vadd.f32 %v661_v42, %v615_v41 }
 0x1e4   : > { %v667_v44 = vmul.f32 1.442695, %v665_v43 }
 0x1e6   : > { %1246 = vpow2.f32 %v667_v44 }
 0x1e9   : > { %v664_v46 = vpop.xlane.xlu1 %663 }
 0x1ea   : > { %v666_v48 = vsub.f32 %v656_v29, %v664_v46  ;;  %v749_v49 = vadd.f32 %v664_v46, %v618_v45  ;;  %v745_v29 = vpop.f32.mrf.mxu3 }
 0x1eb   : > { %v746_v31 = vadd.f32 %v1245_v30, %v745_v29 }
 0x1ec   : > { %v1247_v50 = vpop.eup %1246  ;;  %v669_v51 = vmul.f32 1.442695, %v666_v48  ;;  %v751_v52 = vmax.f32 %v748_v47, %v749_v49 }
 0x1ed   : > { %1117 = vmatmul.msk.f32.vlgmr.msra.gmra.mxu2 %vm658_vm2, %v1247_v50  ;;  %v671_v53 = vsel %vm658_vm2, %v1247_v50, 0.0 }
 0x1ee   : > { %1248 = vpow2.f32 %v669_v51  ;;  %v752_v54 = vrot.slane %v751_v52, 4  ;;  %672 = vadd.xlane.f32.xlu1 %v671_v53 }
 0x1f0   : > { %v753_v55 = vmax.f32 %v751_v52, %v752_v54 }
 0x1f2   : > { %v754_v56 = vrot.slane %v753_v55, 2 }
 0x1f4   : > { %v1249_v57 = vpop.eup %1248  ;;  %v755_v58 = vmax.f32 %v753_v55, %v754_v56 }
 0x1f5   : > { %1118 = vmatmul.msk.f32.gmra.mxu2 %vm658_vm2, %v1249_v57  ;;  %v674_v59 = vsel %vm658_vm2, %v1249_v57, 0.0 }
 0x1f6   : > { %v756_v60 = vrot.slane %v755_v58, 1  ;;  %675 = vadd.xlane.f32.xlu2 %v674_v59 }
 0x1f8   : > { %v757_v62 = vmax.f32 %v755_v58, %v756_v60 }
 0x1fa   : > { %v758_v63 = vmax.f32 %v750_v61, %v757_v62 }
 0x1fc   : > { %v763_v0 = vperm.slane %v758_v63, 0  ;;  %818 = vst.msk [vmem:[#allocation5] sm:$0x1] %vm599_vm3, %v758_v63  ;;  %v759_v5 = vsub.f32 %v750_v61, %v758_v63  ;;  %v786_v63 = vld [vmem:[#allocation7] sm:$0x1] }
 0x1fe   : > { %v765_v1 = vsub.f32 %v748_v47, %v763_v0  ;;  %v766_v2 = vsub.f32 %v749_v49, %v763_v0  ;;  %v760_v9 = vmul.f32 1.442695, %v759_v5 }
 0x200   : > { %v767_v3 = vmul.f32 1.442695, %v765_v1  ;;  %v769_v4 = vmul.f32 1.442695, %v766_v2 }
 0x202   : > { %1250 = vpow2.f32 %v767_v3 }
 0x203   : > { %1252 = vpow2.f32 %v769_v4 }
 0x204   : > { %1254 = vpow2.f32 %v760_v9 }
 0x208   : > { %v1251_v6 = vpop.eup %1250 }
 0x209   : > { %v1253_v7 = vpop.eup %1252  ;;  %v774_v8 = vsel %vm773_vm4, %v1251_v6, 0.0 }
 0x20a   : > { %v775_v10 = vsel %vm773_vm4, %v1253_v7, 0.0  ;;  %v1255_v16 = vpop.eup %1254 }
 0x20b   : > { %v776_v11 = vadd.f32 %v775_v10, %v774_v8  ;;  %v772_v20 = vmul.f32 %v1255_v16, %v771_v17 }
 0x20d   : > { %v777_v12 = vrot.slane %v776_v11, 4 }
 0x20f   : > { %v778_v13 = vadd.f32 %v777_v12, %v776_v11 }
 0x211   : > { %v779_v14 = vrot.slane %v778_v13, 2 }
 0x213   : > { %v780_v15 = vadd.f32 %v779_v14, %v778_v13 }
 0x215   : > { %v781_v18 = vrot.slane %v780_v15, 1 }
 0x217   : > { %v782_v19 = vadd.f32 %v781_v18, %v780_v15 }
 0x219   : > { %v783_v21 = vadd.f32 %v782_v19, %v772_v20 }
 0x21b   : > { %785 = vst.msk [vmem:[#allocation6] sm:$0x1] %vm599_vm3, %v783_v21 }
 0x222   : > { %v849_v39 = vld [vmem:[#allocation6] sm:$0x1] }
 0x261   : > { %v673_v23 = vpop.xlane.xlu1 %672 }
 0x262   : > { %1256 = vrcp.f32 %v673_v23 }
 0x268   : > { %v1257_v26 = vpop.eup %1256 }
 0x269   : > { %v676_v25 = vpop.xlane.xlu2 %675 }
 0x26a   : > { %1258 = vrcp.f32 %v676_v25 }
 0x26b   : > { %1260 = vrcp.f32 %v849_v39 }
 0x270   : > { %v701_v27 = vpop.f32.mrf.mxu2  ;;  %v1259_v32 = vpop.eup %1258 }
 0x271   : > { %v709_v28 = vmul.f32 %v1257_v26, %v701_v27  ;;  %v1261_v40 = vpop.eup %1260 }
 0x273   : > { %823 = vrot.lane.b32.xlu1 %v709_v28, %s1543_s15  ;;  %v819_v38 = vmul.f32 %v743_v36, %v709_v28 }
 0x278   : > { %v704_v33 = vpop.f32.mrf.mxu2 }
 0x279   : > { %v710_v34 = vmul.f32 %v1259_v32, %v704_v33 }
 0x27b   : > { %796 = vperm.xlu1 %1238, %v1251_v6   ;;  %825 = vrot.lane.b32.xlu2 %v710_v34, %s1543_s15  ;;  %v820_v35 = vmul.f32 %v746_v31, %v710_v34 }
 0x27d   : > { %833 = vrot.lane.b32.xlu0 %v820_v35, %s1544_s10 }
 0x283   : > { %789 = vperm.xlu1 %1238, %v1255_v16   ;;  %831 = vrot.lane.b32.xlu2 %v819_v38, %s1544_s10 }
 0x28b   : > { %801 = vperm.xlu2 %1239, %v1253_v7  }
 0x293   : > { %853 = vperm.xlu2 %1239, %v1261_v40  }
 0x2d5   : > { %v826_v41 = vpop.permute.xlu2 %825 }
 0x2d6   : > { %v838_v49 = vsel %vm517_vm0, %v746_v31, %v826_v41 }
 0x2dd   : > { %v832_v42 = vpop.permute.xlu2 %831 }
 0x2e5   : > { %v824_v43 = vpop.permute.xlu1 %823  ;;  %v802_v46 = vpop.permute.xlu2 %801 }
 0x2e6   : > { %v837_v44 = vsel %vm517_vm0, %v743_v36, %v824_v43  ;;  %v805_v47 = vmul.f32 %v802_v46, %v746_v31 }
 0x2e7   : > { %v840_v45 = vsel %vm839_vm6, %v837_v44, %v832_v42 }
 0x2e8   : > { %843 = vst.msk [vmem:[%s1811_s21] sm:$0xff] %vm842_vm7, %v840_v45  ;;  %v807_v52 = vsel %vm517_vm0, %v805_v47, 0.0 }
 0x2ed   : > { %v797_v37 = vpop.permute.xlu1 %796  ;;  %v854_v4 = vpop.permute.xlu2 %853 }
 0x2ee   : > { %v804_v48 = vmul.f32 %v797_v37, %v743_v36  ;;  %v856_v6 = vperm.slane %v854_v4, 0 }
 0x2ef   : > { %v834_v50 = vpop.permute.xlu0 %833  ;;  %v858_v51 = vld [vmem:[%s1811_s21] sm:$0xff] }
 0x2f0   : > { %v806_v53 = vsel %vm517_vm0, %v804_v48, 0.0  ;;  %v841_v54 = vsel %vm839_vm6, %v838_v49, %v834_v50  ;;  %865 = vrot.lane.b32.xlu1 %v858_v51, %s1545_s11 }
 0x2f1   : > { %v808_v55 = vadd.f32 %v807_v52, %v806_v53  ;;  %844 = vst.msk [vmem:[%s1811_s21 + $0x8] sm:$0xff] %vm842_vm7, %v841_v54 }
 0x2f3   : > { %v809_v56 = vrot.slane %v808_v55, 4 }
 0x2f5   : > { %v810_v57 = vadd.f32 %v809_v56, %v808_v55  ;;  %v790_v58 = vpop.permute.xlu1 %789 }
 0x2f6   : > { %v792_v62 = vperm.slane %v790_v58, 0 }
 0x2f7   : > { %v811_v59 = vrot.slane %v810_v57, 2 }
 0x2f8   : > { %v859_v60 = vld [vmem:[%s1811_s21 + $0x8] sm:$0xff]  ;;  %v793_v1 = vmul.f32 %v792_v62, %v786_v63 }
 0x2f9   : > { %v812_v61 = vadd.f32 %v811_v59, %v810_v57  ;;  %867 = vrot.lane.b32.xlu2 %v859_v60, %s1545_s11 }
 0x2fb   : > { %v813_v0 = vrot.slane %v812_v61, 1 }
 0x2fd   : > { %v814_v2 = vadd.f32 %v813_v0, %v812_v61 }
 0x2ff   : > { %v815_v3 = vadd.f32 %v814_v2, %v793_v1 }
 0x301   : > { %817 = vst.msk [vmem:[#allocation7] sm:$0x1] %vm602_vm5, %v815_v3 }
 0x308   : > { %v848_v5 = vld [vmem:[#allocation7] sm:$0x1] }
 0x309   : > { %v857_v7 = vmul.f32 %v856_v6, %v848_v5 }
 0x30b   : > { %v861_v8 = vperm.slane %v857_v7, 0 }
 0x353   : > { %v868_v9 = vpop.permute.xlu2 %867 }
 0x354   : > { %v872_v10 = vmul.f32 %v868_v9, %v861_v8 }
 0x356   : > { %877 = vrot.lane.b32.xlu2 %v872_v10, %s1545_s11 }
 0x357   : > { %1439 = shalt.err (!%p1436_p11)
}
 0x358   : > { %1145 = dma.vmem_to_hbm [thread:$0]  (%p1679_p4), %s920_s25, 128, %s922_s28, %s890_s30   ;;  %vm881_vm8 = vcmask 1048320  }
 0x359   : > { %s1129_s5 = sshll.u32 %s1526_s16, 4  ;;  %s1935_s13 = sld [smem:[#allocation35_spill]] }
 0x35a   : > { %s902_s27 = sshll.u32 %s1811_s21, 4  ;;  %s885_s25 = scalar_lea.sflag [#allocation10], %s1735_s1  ;;  %s903_s27 = int_to_ptr.vmem [resolvable:$true] %s902_s27 }
 0x35f   : > { %s1936_s7 = smov %s1935_s13  ;;  %s901_s18 = scalar_lea.hbm %s1935_s13, %s1129_s5 }
 0x360   : > { %s904_s22 = sshll.u32 %s901_s18, 4  ;;  %s1460_s19 = scalar_lea.hbm %s1936_s7, 32  ;;  %s905_s22 = int_to_ptr.hbm [resolvable:$true] %s904_s22 }
 0x361   : > { %s1454_s28 = sshra.s32 %s905_s22, 4  ;;  %s1455_s28 = int_to_ptr.hbm [resolvable:$true] %s1454_s28 }
 0x362   : > { %v866_v11 = vpop.permute.xlu1 %865  ;;  %s1456_s30 = scalar_lea.hbm %s1455_s28, 16  ;;  %p1461_p2 = scmp.lt.s32.totalorder %s1455_s28, %s1936_s7 }
 0x363   : > { %v871_v12 = vmul.f32 %v866_v11, %v861_v8  ;;  %p1457_p12 = scmp.ne.s32.totalorder %s1455_s28, %s1456_s30  ;;  %p1462_p9 = scmp.lt.s32.totalorder %s1460_s19, %s1456_s30 }
 0x365   : > { %875 = vrot.lane.b32.xlu1 %v871_v12, %s1545_s11  ;;  %p1458_p13 = pnand %p1457_p12, %p1679_p4  ;;  %p1463_p1 = por %p1462_p9, %p1461_p2 }
 0x367   : > { %p1459_p0 = pneg %p1458_p13 }
 0x369   : > { %p1464_p3 = pnand %p1463_p1, %p1459_p0 }
 0x3b0   : > { %v878_v13 = vpop.permute.xlu2 %877 }
 0x3b1   : > { %883 = vst.msk [vmem:[%s1811_s21 + $0x8] sm:$0xff] %vm881_vm8, %v878_v13 }
 0x3d7   : > { %v876_v14 = vpop.permute.xlu1 %875 }
 0x3d8   : > { %882 = vst.msk [vmem:[%s1811_s21] sm:$0xff] %vm881_vm8, %v876_v14 }
 0x3d9   : > { %1467 = shalt.err (!%p1464_p3)
}
 0x3da   : > { %s1546_s1 = smov 128   ;;  %s1547_s21 = smov 8  }
 0x3db   : > { %1144 = dma.vmem_to_hbm [thread:$0]  (%p1679_p4), %s903_s27, 256, %s905_s22, %s885_s25, %s1546_s1, %s1546_s1, %s1547_s21  }
 0x3dc PF: > { %s1937_s29 = sld [smem:[#allocation25_spill]] }
 0x3dd   : > { %s1939_s20 = sld [smem:[#allocation27_spill]] }
 0x3e2   : > { %s933_s5 = sand.u32 1, %s1937_s29  }
 0x3e3   : > { %p1940_p5 = scmp.ge.s32.totalorder %s1939_s20, 2  ;;  %s934_s26 = scalar_lea.sflag [#allocation10], %s933_s5 }
 0x3e5   : > { %p1166_p6 = pnand %p1940_p5, %p1687_p7 }
 0x3e7   : > { %p1167_p8 = pneg %p1166_p6 }
 0x3e9   : > { %1505 = dma.done.wait (%p1167_p8), %s934_s26, 256  }
 0x3ea   : > { %1507 = vsyncadd (%p1167_p8), %s934_s26, 4294967040  ;;  %s944_s10 = scalar_lea.sflag [#allocation19], %s933_s5 }
 0x3eb   : > { %1509 = dma.done.wait (%p1167_p8), %s944_s10, 128  }
 0x3ec   : > { %1511 = vsyncadd (%p1167_p8), %s944_s10, 4294967168  ;;  %s34_s18 = sadd.s32 1, %s1939_s20   ;;  %s1941_s9 = sld [smem:[#allocation26_spill]] }
 0x3ed   : > { %p31_p10 = scmp.ge.s32.totalorder %s34_s18, 4   ;;  %s1942_s15 = sld [smem:[#allocation30_spill]] }
 0x3ee   : > { %s1943_s27 = sld [smem:[#allocation28_spill]]  ;;  %s1944_s13 = smov %s1518_s14 }
 0x3ef   : > { %s1946_s16 = smov %s1530_s17 }
 0x3f0   :  { %33 = sbr.rel (!%p31_p10) target bundleno = 17 (0x11), region = 158 }
 0x3f2   : > { %s1945_s14 = smov %s1941_s9 }
 0x3f4   : > { %s1947_s17 = smov %s1943_s27 }
 0x3f5   :  { %950 = vsyncpa [#allocation9], 1 }
 0x3f6   :  { %952 = vsyncpa [#allocation9 + $0x1], 1 }
 0x3f7   :  { %953 = vsyncpa [#allocation12], 1 }
 0x3f8   :  { %955 = vsyncpa [#allocation12 + $0x1], 1 }
 0x3f9   :  { %956 = vsyncpa [#allocation15], 1 }
 0x3fa   :  { %957 = vsyncpa [#allocation10], 1 }
 0x3fb   :  { %959 = vsyncpa [#allocation10 + $0x1], 1 }
 0x3fc   :  { %960 = vsyncpa [#allocation19], 1 }
 0x3fd   :  { %962 = vsyncpa [#allocation19 + $0x1], 1 }

</bundles_post_ra>
